<compile_context>
chip_gen: v6e
topology: v6e:2x2x1
jax: 0.10.0
libtpu: 0.0.40
codegen_flags: <defaults>
</compile_context>

<pallas_src>
import math

import jax
import jax.numpy as jnp
from jax import lax
from jax.experimental import pallas as pl
from jax.experimental.pallas import tpu as pltpu

LN_EPS = 1e-5


# --------------------------------------------------------------------------- #
# Kernel body
# --------------------------------------------------------------------------- #
def poly_sa_kernel(x_ref, wqkv_ref, wp_ref, bp_ref, p1e_ref, p2e_ref,
                   pool2_ref, gamma_ref, beta_ref, o_ref):
    TB, N, GC = x_ref.shape
    xb = x_ref[...].reshape(TB * N, GC)                            # (TB*N, GC)

    # Fused qkv projection: one MXU pass with 3*GC output lanes.
    qkv = jnp.dot(xb.astype(wqkv_ref.dtype), wqkv_ref[...],
                  preferred_element_type=jnp.float32)              # (TB*N, 3GC)
    q = qkv[:, :GC]
    k = qkv[:, GC:2 * GC]
    v = qkv[:, 2 * GC:]

    # modulator[b, h*hd+d] = sum_n p2[h, n] * (k*v)[b, n, h*hd+d]
    kv = (k * v).reshape(TB, N, GC)
    mod = jnp.sum(p2e_ref[...][None, :, :] * kv, axis=1)           # (TB, GC)

    # Per-head LayerNorm.  A single fused block-diagonal pooling matmul
    # produces [mean | E[x^2]]; one-pass variance in f32 (clamped >= 0).
    stats_in = jnp.concatenate([mod, mod * mod], axis=-1)          # (TB, 2GC)
    stats = jnp.dot(stats_in, pool2_ref[...],
                    preferred_element_type=jnp.float32)            # (TB, 2GC)
    mean = stats[:, :GC]
    ex2 = stats[:, GC:]
    var = jnp.maximum(ex2 - mean * mean, 0.0)
    modn = (mod - mean) * lax.rsqrt(var + LN_EPS)
    modn = modn * gamma_ref[...] + beta_ref[...]                   # (TB, GC)

    # modulator2[b, n, h*hd+d] = p1[h, n] * modn[b, h*hd+d]
    mod2 = (p1e_ref[...][None, :, :] * modn[:, None, :]).reshape(TB * N, GC)

    # Output projection; lane-dense (multiple-of-128) store.
    y = jnp.dot((q * mod2).astype(wp_ref.dtype), wp_ref[...],
                preferred_element_type=jnp.float32) + bp_ref[...]
    o_ref[...] = y.reshape(TB, N, GC).astype(o_ref.dtype)


# --------------------------------------------------------------------------- #
# Wrapper-side helpers
# --------------------------------------------------------------------------- #
def _block_diag(w, g):
    """Replicate a (cin, cout) matrix as a g-way block-diagonal matrix."""
    if g == 1:
        return w
    cin, cout = w.shape
    eye = jnp.eye(g, dtype=w.dtype)
    bd = eye[:, :, None, None] * w[None, None, :, :]       # (g, g, cin, cout)
    return bd.transpose(0, 2, 1, 3).reshape(g * cin, g * cout)


def _device_kind():
    try:
        return jax.devices()[0].device_kind.lower()
    except Exception:
        return ""


def tpu_generation():
    """Best-effort TPU generation (0 = unknown)."""
    kind = _device_kind()
    if "v7" in kind or "tpu7" in kind or "7x" in kind:
        return 7
    for g in (6, 5, 4, 3, 2):
        if f"v{g}" in kind:
            return g
    return 0


def _vmem_capacity_bytes(gen):
    try:
        return int(pltpu.get_tpu_info().vmem_capacity_bytes)
    except Exception:
        return (64 << 20) if gen >= 7 else (128 << 20)


def _pick_lane_pack(c, b, gen):
    """Smallest G making G*C a multiple of 128; widen to 256 on v6e/v7x."""
    g128 = 128 // math.gcd(c, 128)
    if gen >= 6:
        g256 = 256 // math.gcd(c, 256)
        if g256 > g128 and b >= g256:        # don't over-pad tiny batches
            return g256
    return g128


def _pick_batch_tile(bp, n, gc, io_bytes, weight_bytes, vmem_limit, multi_core):
    """Target ~2048 rows (TB*N) per grid step, bounded by remaining VMEM."""
    tb = max(1, 2048 // max(n, 1))
    # Per packed-batch row: in/out tiles (x2 buffers each) + f32 temporaries
    # (qkv slab 3GC + kv/mod2/qmod2/y + casts ~ 32 bytes/lane).
    per_row = gc * (2 * io_bytes + 32)
    budget = vmem_limit - 2 * weight_bytes - (8 << 20)   # headroom for mosaic
    tb_vmem = max(1, budget // max(per_row * n, 1))
    tb = min(tb, tb_vmem, bp)
    if multi_core and bp >= 2:
        tb = min(tb, -(-bp // 2))            # keep >=2 grid steps for 2 TCs
    return max(int(tb), 1)


# --------------------------------------------------------------------------- #
# Public entry point
# --------------------------------------------------------------------------- #
def poly_self_attention(x, wq, wk, wv, wp, bp, p1, p2, gamma, beta, num_heads,
                        *, use_bf16_matmul=None):
    """x: (B, N, C).  Weights already transposed for x @ W.
    use_bf16_matmul=None -> auto (bf16 MXU operands on v6e/v7x, f32 elsewhere).
    bf16 activations pass straight through (output keeps x's dtype)."""
    B, N, C = x.shape
    H = num_heads
    hd = C // H

    gen = tpu_generation()
    multi_core = gen >= 7                       # v7x: 2 TensorCores per chip
    if use_bf16_matmul is None:
        use_bf16_matmul = gen >= 6              # f32 MXU is multi-pass there

    # ---- lane packing: G batch elems per lane group -> GC multiple of 128 --
    G = _pick_lane_pack(C, B, gen)
    GC = G * C
    B_pad = -(-B // G) * G
    if B_pad != B:
        x = jnp.concatenate([x, jnp.zeros((B_pad - B, N, C), x.dtype)], axis=0)
    Bp = B_pad // G
    xp = x.reshape(Bp, G, N, C).transpose(0, 2, 1, 3).reshape(Bp, N, GC)

    # ---- parameter glue (built once, wrapper-side) -------------------------
    mxu_dtype = jnp.bfloat16 if use_bf16_matmul else jnp.float32
    wqkv_p = jnp.concatenate(
        [_block_diag(wq, G), _block_diag(wk, G), _block_diag(wv, G)],
        axis=1).astype(mxu_dtype)                                  # (GC, 3GC)
    wp_p = _block_diag(wp, G).astype(mxu_dtype)                    # (GC, GC)
    bp_p = jnp.tile(bp, G)[None, :].astype(jnp.float32)            # (1, GC)

    heads = jnp.arange(C) // hd
    pool = (heads[:, None] == heads[None, :]).astype(jnp.float32) / hd
    pool2_p = _block_diag(pool, 2 * G)                             # (2GC, 2GC)

    p1e = jnp.tile(jnp.repeat(p1, hd, axis=0).T, (1, G)).astype(jnp.float32)
    p2e = jnp.tile(jnp.repeat(p2, hd, axis=0).T, (1, G)).astype(jnp.float32)
    gamma_p = jnp.tile(gamma, H * G)[None, :].astype(jnp.float32)  # (1, GC)
    beta_p = jnp.tile(beta, H * G)[None, :].astype(jnp.float32)    # (1, GC)

    # ---- generation-aware VMEM budget & batch-tile choice ------------------
    vmem_phys = _vmem_capacity_bytes(gen)
    vmem_limit = int(min(vmem_phys - (16 << 20), 96 << 20))
    weight_bytes = int(
        wqkv_p.size * wqkv_p.dtype.itemsize + wp_p.size * wp_p.dtype.itemsize
        + pool2_p.size * 4 + (p1e.size + p2e.size) * 4 + 3 * GC * 4)
    io_bytes = 2 * x.dtype.itemsize             # x tile in + out tile out
    TB = _pick_batch_tile(Bp, N, GC, io_bytes, weight_bytes, vmem_limit,
                          multi_core)

    # Pad the packed batch so the grid divides evenly (and is even on v7x so
    # both TensorCores get equal work); padded rows are sliced off below.
    num_steps = -(-Bp // TB)
    if multi_core and num_steps > 1 and num_steps % 2:
        num_steps += 1
    Bp_run = num_steps * TB
    if Bp_run != Bp:
        xp = jnp.concatenate(
            [xp, jnp.zeros((Bp_run - Bp, N, GC), xp.dtype)], axis=0)

    def _call(single_buffer_weights):
        if single_buffer_weights:
            inv = lambda shape: pl.BlockSpec(shape, lambda b: (0, 0),
                                             pipeline_mode=pl.Buffered(1))
        else:
            inv = lambda shape: pl.BlockSpec(shape, lambda b: (0, 0))
        return pl.pallas_call(
            poly_sa_kernel,
            out_shape=jax.ShapeDtypeStruct((Bp_run, N, GC), x.dtype),
            grid_spec=pltpu.PrefetchScalarGridSpec(
                num_scalar_prefetch=0,
                grid=(num_steps,),
                in_specs=[
                    pl.BlockSpec((TB, N, GC), lambda b: (b, 0, 0)),  # x packed
                    inv((GC, 3 * GC)),                               # wqkv
                    inv((GC, GC)),                                   # wp
                    inv((1, GC)),                                    # bp
                    inv((N, GC)),                                    # p1e
                    inv((N, GC)),                                    # p2e
                    inv((2 * GC, 2 * GC)),                           # pool2
                    inv((1, GC)),                                    # gamma
                    inv((1, GC)),                                    # beta
                ],
                out_specs=pl.BlockSpec((TB, N, GC), lambda b: (b, 0, 0)),
            ),
            compiler_params=pltpu.CompilerParams(
                dimension_semantics=("parallel",),
                vmem_limit_bytes=vmem_limit,
            ),
        )(xp, wqkv_p, wp_p, bp_p, p1e, p2e, pool2_p, gamma_p, beta_p)

    try:
        # Grid-invariant params single-buffered: constant index_map, so a
        # second buffer only doubles their VMEM footprint.
        out_p = jax.block_until_ready(_call(True))
    except Exception:
        # Fallback: default (double-buffered) invariant specs.
        out_p = _call(False)

    # ---- un-pack lanes back to (B, N, C) -----------------------------------
    out = (out_p[:Bp].reshape(Bp, N, G, C)
                 .transpose(0, 2, 1, 3)
                 .reshape(B_pad, N, C))
    return out[:B]


# --------------------------------------------------------------------------- #
# Pure-JAX reference (mirrors the PyTorch forward exactly)
# --------------------------------------------------------------------------- #
def reference_poly_sa(x, wq, wk, wv, wp, bp, p1, p2, gamma, beta, num_heads):
    B, N, C = x.shape
    hd = C // num_heads
    q = (x @ wq).reshape(B, N, num_heads, hd).transpose(0, 2, 1, 3)
    k = (x @ wk).reshape(B, N, num_heads, hd).transpose(0, 2, 1, 3)
    v = (x @ wv).reshape(B, N, num_heads, hd).transpose(0, 2, 1, 3)
    mod = jnp.einsum('hn,bhnd->bhd', p2, k * v)
    mu = mod.mean(-1, keepdims=True)
    var = ((mod - mu) ** 2).mean(-1, keepdims=True)
    modn = (mod - mu) / jnp.sqrt(var + LN_EPS) * gamma + beta
    mod2 = jnp.einsum('hn,bhd->bhnd', p1, modn)
    y = (q * mod2).transpose(0, 2, 1, 3).reshape(B, N, C)
    return y @ wp + bp


if __name__ == "__main__":
    # Small shapes consistent with the module: dim=32, seq_len=8, num_heads=8.
    B, N, C, H = 2, 8, 32, 8

    key = jax.random.PRNGKey(0)
    ks = jax.random.split(key, 8)
    x = jax.random.normal(ks[0], (B, N, C), jnp.float32)

    # Deterministic synthetic parameters (shapes from __init__):
    #  qkv: Linear(C, 3C, bias=False) -> wq/wk/wv, pre-transposed for x @ W.
    #  proj: Linear(C, C)             -> wp (transposed), bp.
    #  p1, p2: (H, N), trunc_normal(std=0.02) ~ normal*0.02.
    #  norm: LayerNorm(head_dim)      -> gamma=1, beta=0 (default init).
    wq = jax.random.normal(ks[1], (C, C), jnp.float32) * 0.1
    wk = jax.random.normal(ks[2], (C, C), jnp.float32) * 0.1
    wv = jax.random.normal(ks[3], (C, C), jnp.float32) * 0.1
    wp = jax.random.normal(ks[4], (C, C), jnp.float32) * 0.1
    bp = jax.random.normal(ks[5], (C,), jnp.float32) * 0.1
    p1 = jax.random.normal(ks[6], (H, N), jnp.float32) * 0.02
    p2 = jax.random.normal(ks[7], (H, N), jnp.float32) * 0.02
    gamma = jnp.ones((C // H,), jnp.float32)
    beta = jnp.zeros((C // H,), jnp.float32)

    # attn_drop / proj_drop default to 0.0 -> identity; phi is nn.Identity().
    # bf16 MXU operands on v6e/v7x (relaxed tolerance), f32 elsewhere (1e-4).
    use_bf16 = tpu_generation() >= 6
    out = poly_self_attention(x, wq, wk, wv, wp, bp, p1, p2, gamma, beta, H,
                              use_bf16_matmul=use_bf16)
    out = jax.block_until_ready(out)

    ref = reference_poly_sa(x, wq, wk, wv, wp, bp, p1, p2, gamma, beta, H)
    assert out.shape == (B, N, C)
    tol = 2e-2 if use_bf16 else 1e-4
    assert jnp.allclose(out, ref, atol=tol, rtol=tol), "mismatch vs reference"
    print("KERNEL_OK")
</pallas_src>

<mosaic_0001>
module attributes {stable_mosaic.version = 11 : i64} {
  func.func @poly_sa_kernel(%arg0: i32, %arg1: memref<1x8x128xf32, #tpu.memory_space<vmem>>, %arg2: memref<128x384xf32, #tpu.memory_space<vmem>>, %arg3: memref<128x128xf32, #tpu.memory_space<vmem>>, %arg4: memref<1x128xf32, #tpu.memory_space<vmem>>, %arg5: memref<8x128xf32, #tpu.memory_space<vmem>>, %arg6: memref<8x128xf32, #tpu.memory_space<vmem>>, %arg7: memref<256x256xf32, #tpu.memory_space<vmem>>, %arg8: memref<1x128xf32, #tpu.memory_space<vmem>>, %arg9: memref<1x128xf32, #tpu.memory_space<vmem>>, %arg10: memref<1x8x128xf32, #tpu.memory_space<vmem>>) attributes {dimension_semantics = [#tpu.dimension_semantics<parallel>], iteration_bounds = array<i64: 1>, scalar_prefetch = 0 : i64, scratch_operands = 0 : i64, tpu.core_type = #tpu.core_type<tc>, window_params = [{transform_indices = @transform_0, window_bounds = array<i64: 1, 8, 128>}, {pipeline_mode = #tpu.pipeline_mode<synchronous>, transform_indices = @transform_1, window_bounds = array<i64: 128, 384>}, {pipeline_mode = #tpu.pipeline_mode<synchronous>, transform_indices = @transform_2, window_bounds = array<i64: 128, 128>}, {pipeline_mode = #tpu.pipeline_mode<synchronous>, transform_indices = @transform_3, window_bounds = array<i64: 1, 128>}, {pipeline_mode = #tpu.pipeline_mode<synchronous>, transform_indices = @transform_4, window_bounds = array<i64: 8, 128>}, {pipeline_mode = #tpu.pipeline_mode<synchronous>, transform_indices = @transform_5, window_bounds = array<i64: 8, 128>}, {pipeline_mode = #tpu.pipeline_mode<synchronous>, transform_indices = @transform_6, window_bounds = array<i64: 256, 256>}, {pipeline_mode = #tpu.pipeline_mode<synchronous>, transform_indices = @transform_7, window_bounds = array<i64: 1, 128>}, {pipeline_mode = #tpu.pipeline_mode<synchronous>, transform_indices = @transform_8, window_bounds = array<i64: 1, 128>}, {transform_indices = @transform_9, window_bounds = array<i64: 1, 8, 128>}]} {
    %c0 = arith.constant 0 : index
    %c0_0 = arith.constant 0 : index
    %c0_1 = arith.constant 0 : index
    %0 = vector.load %arg1[%c0, %c0_0, %c0_1] : memref<1x8x128xf32, #tpu.memory_space<vmem>>, vector<1x8x128xf32>
    %1 = vector.shape_cast %0 : vector<1x8x128xf32> to vector<8x128xf32>
    %c0_2 = arith.constant 0 : index
    %c0_3 = arith.constant 0 : index
    %2 = vector.load %arg2[%c0_2, %c0_3] : memref<128x384xf32, #tpu.memory_space<vmem>>, vector<128x384xf32>
    %cst = arith.constant dense<0.000000e+00> : vector<8x384xf32>
    %3 = tpu.matmul %1, %2, %cst {dimension_numbers = #tpu.dot_dimension_numbers<[1], [0], [0], [1], [0, 0, 1, 1], [], []>} : vector<8x128xf32>, vector<128x384xf32>, vector<8x384xf32> -> vector<8x384xf32>
    %4 = vector.extract_strided_slice %3 {offsets = [0, 0], sizes = [8, 128], strides = [1, 1]} : vector<8x384xf32> to vector<8x128xf32>
    %5 = vector.extract_strided_slice %3 {offsets = [0, 128], sizes = [8, 128], strides = [1, 1]} : vector<8x384xf32> to vector<8x128xf32>
    %6 = vector.extract_strided_slice %3 {offsets = [0, 256], sizes = [8, 128], strides = [1, 1]} : vector<8x384xf32> to vector<8x128xf32>
    %7 = arith.mulf %5, %6 : vector<8x128xf32>
    %8 = vector.shape_cast %7 : vector<8x128xf32> to vector<1x8x128xf32>
    %c0_4 = arith.constant 0 : index
    %c0_5 = arith.constant 0 : index
    %9 = vector.load %arg6[%c0_4, %c0_5] : memref<8x128xf32, #tpu.memory_space<vmem>>, vector<8x128xf32>
    %10 = vector.shape_cast %9 : vector<8x128xf32> to vector<1x8x128xf32>
    %11 = arith.mulf %10, %8 : vector<1x8x128xf32>
    %cst_6 = arith.constant dense<0.000000e+00> : vector<1x128xf32>
    %12 = vector.multi_reduction <add>, %11, %cst_6 [1] : vector<1x8x128xf32> to vector<1x128xf32>
    %13 = arith.mulf %12, %12 : vector<1x128xf32>
    %14 = tpu.concatenate %12, %13 in 1 : vector<1x128xf32>, vector<1x128xf32> -> vector<1x256xf32>
    %c0_7 = arith.constant 0 : index
    %c0_8 = arith.constant 0 : index
    %15 = vector.load %arg7[%c0_7, %c0_8] : memref<256x256xf32, #tpu.memory_space<vmem>>, vector<256x256xf32>
    %cst_9 = arith.constant dense<0.000000e+00> : vector<1x256xf32>
    %16 = tpu.matmul %14, %15, %cst_9 {dimension_numbers = #tpu.dot_dimension_numbers<[1], [0], [0], [1], [0, 0, 1, 1], [], []>} : vector<1x256xf32>, vector<256x256xf32>, vector<1x256xf32> -> vector<1x256xf32>
    %17 = vector.extract_strided_slice %16 {offsets = [0, 0], sizes = [1, 128], strides = [1, 1]} : vector<1x256xf32> to vector<1x128xf32>
    %18 = vector.extract_strided_slice %16 {offsets = [0, 128], sizes = [1, 128], strides = [1, 1]} : vector<1x256xf32> to vector<1x128xf32>
    %19 = arith.mulf %17, %17 : vector<1x128xf32>
    %20 = arith.subf %18, %19 : vector<1x128xf32>
    %cst_10 = arith.constant 0.000000e+00 : f32
    %21 = vector.broadcast %cst_10 : f32 to vector<1x128xf32>
    %22 = arith.maximumf %20, %21 : vector<1x128xf32>
    %23 = arith.subf %12, %17 : vector<1x128xf32>
    %cst_11 = arith.constant 9.99999974E-6 : f32
    %24 = vector.broadcast %cst_11 : f32 to vector<1x128xf32>
    %25 = arith.addf %22, %24 : vector<1x128xf32>
    %26 = math.rsqrt %25 : vector<1x128xf32>
    %27 = arith.mulf %23, %26 : vector<1x128xf32>
    %c0_12 = arith.constant 0 : index
    %c0_13 = arith.constant 0 : index
    %28 = vector.load %arg8[%c0_12, %c0_13] : memref<1x128xf32, #tpu.memory_space<vmem>>, vector<1x128xf32>
    %29 = arith.mulf %27, %28 : vector<1x128xf32>
    %c0_14 = arith.constant 0 : index
    %c0_15 = arith.constant 0 : index
    %30 = vector.load %arg9[%c0_14, %c0_15] : memref<1x128xf32, #tpu.memory_space<vmem>>, vector<1x128xf32>
    %31 = arith.addf %29, %30 : vector<1x128xf32>
    %c0_16 = arith.constant 0 : index
    %c0_17 = arith.constant 0 : index
    %32 = vector.load %arg5[%c0_16, %c0_17] : memref<8x128xf32, #tpu.memory_space<vmem>>, vector<8x128xf32>
    %33 = vector.shape_cast %32 : vector<8x128xf32> to vector<1x8x128xf32>
    %34 = vector.shape_cast %31 : vector<1x128xf32> to vector<1x1x128xf32>
    %35 = vector.broadcast %34 : vector<1x1x128xf32> to vector<1x8x128xf32>
    %36 = arith.mulf %33, %35 : vector<1x8x128xf32>
    %37 = vector.shape_cast %36 : vector<1x8x128xf32> to vector<8x128xf32>
    %38 = arith.mulf %4, %37 : vector<8x128xf32>
    %c0_18 = arith.constant 0 : index
    %c0_19 = arith.constant 0 : index
    %39 = vector.load %arg3[%c0_18, %c0_19] : memref<128x128xf32, #tpu.memory_space<vmem>>, vector<128x128xf32>
    %cst_20 = arith.constant dense<0.000000e+00> : vector<8x128xf32>
    %40 = tpu.matmul %38, %39, %cst_20 {dimension_numbers = #tpu.dot_dimension_numbers<[1], [0], [0], [1], [0, 0, 1, 1], [], []>} : vector<8x128xf32>, vector<128x128xf32>, vector<8x128xf32> -> vector<8x128xf32>
    %c0_21 = arith.constant 0 : index
    %c0_22 = arith.constant 0 : index
    %41 = vector.load %arg4[%c0_21, %c0_22] : memref<1x128xf32, #tpu.memory_space<vmem>>, vector<1x128xf32>
    %42 = vector.broadcast %41 : vector<1x128xf32> to vector<8x128xf32>
    %43 = arith.addf %40, %42 : vector<8x128xf32>
    %44 = vector.shape_cast %43 : vector<8x128xf32> to vector<1x8x128xf32>
    %c0_23 = arith.constant 0 : index
    %c0_24 = arith.constant 0 : index
    %c0_25 = arith.constant 0 : index
    %45 = vector.load %arg10[%c0_23, %c0_24, %c0_25] : memref<1x8x128xf32, #tpu.memory_space<vmem>>, vector<1x8x128xf32>
    tpu.vector_store %arg10[%c0_23, %c0_24, %c0_25], %44 {strides = array<i32>} : memref<1x8x128xf32, #tpu.memory_space<vmem>>, vector<1x8x128xf32>,
    return
  }
  func.func @transform_0(%arg0: i32) -> (i32, i32, i32) {
    %c0_i32 = arith.constant 0 : i32
    %c0_i32_0 = arith.constant 0 : i32
    %c0_i32_1 = arith.constant 0 : i32
    return %arg0, %c0_i32, %c0_i32_0 : i32, i32, i32
  }
  func.func @transform_1(%arg0: i32) -> (i32, i32) {
    %c0_i32 = arith.constant 0 : i32
    %c0_i32_0 = arith.constant 0 : i32
    %c0_i32_1 = arith.constant 0 : i32
    return %c0_i32, %c0_i32_0 : i32, i32
  }
  func.func @transform_2(%arg0: i32) -> (i32, i32) {
    %c0_i32 = arith.constant 0 : i32
    %c0_i32_0 = arith.constant 0 : i32
    %c0_i32_1 = arith.constant 0 : i32
    return %c0_i32, %c0_i32_0 : i32, i32
  }
  func.func @transform_3(%arg0: i32) -> (i32, i32) {
    %c0_i32 = arith.constant 0 : i32
    %c0_i32_0 = arith.constant 0 : i32
    %c0_i32_1 = arith.constant 0 : i32
    return %c0_i32, %c0_i32_0 : i32, i32
  }
  func.func @transform_4(%arg0: i32) -> (i32, i32) {
    %c0_i32 = arith.constant 0 : i32
    %c0_i32_0 = arith.constant 0 : i32
    %c0_i32_1 = arith.constant 0 : i32
    return %c0_i32, %c0_i32_0 : i32, i32
  }
  func.func @transform_5(%arg0: i32) -> (i32, i32) {
    %c0_i32 = arith.constant 0 : i32
    %c0_i32_0 = arith.constant 0 : i32
    %c0_i32_1 = arith.constant 0 : i32
    return %c0_i32, %c0_i32_0 : i32, i32
  }
  func.func @transform_6(%arg0: i32) -> (i32, i32) {
    %c0_i32 = arith.constant 0 : i32
    %c0_i32_0 = arith.constant 0 : i32
    %c0_i32_1 = arith.constant 0 : i32
    return %c0_i32, %c0_i32_0 : i32, i32
  }
  func.func @transform_7(%arg0: i32) -> (i32, i32) {
    %c0_i32 = arith.constant 0 : i32
    %c0_i32_0 = arith.constant 0 : i32
    %c0_i32_1 = arith.constant 0 : i32
    return %c0_i32, %c0_i32_0 : i32, i32
  }
  func.func @transform_8(%arg0: i32) -> (i32, i32) {
    %c0_i32 = arith.constant 0 : i32
    %c0_i32_0 = arith.constant 0 : i32
    %c0_i32_1 = arith.constant 0 : i32
    return %c0_i32, %c0_i32_0 : i32, i32
  }
  func.func @transform_9(%arg0: i32) -> (i32, i32, i32) {
    %c0_i32 = arith.constant 0 : i32
    %c0_i32_0 = arith.constant 0 : i32
    %c0_i32_1 = arith.constant 0 : i32
    return %arg0, %c0_i32, %c0_i32_0 : i32, i32, i32
  }
}

module attributes {stable_mosaic.version = 11 : i64} {
  func.func @poly_sa_kernel(%arg0: i32, %arg1: memref<1x8x128xf32, #tpu.memory_space<vmem>>, %arg2: memref<128x384xf32, #tpu.memory_space<vmem>>, %arg3: memref<128x128xf32, #tpu.memory_space<vmem>>, %arg4: memref<1x128xf32, #tpu.memory_space<vmem>>, %arg5: memref<8x128xf32, #tpu.memory_space<vmem>>, %arg6: memref<8x128xf32, #tpu.memory_space<vmem>>, %arg7: memref<256x256xf32, #tpu.memory_space<vmem>>, %arg8: memref<1x128xf32, #tpu.memory_space<vmem>>, %arg9: memref<1x128xf32, #tpu.memory_space<vmem>>, %arg10: memref<1x8x128xf32, #tpu.memory_space<vmem>>) attributes {dimension_semantics = [#tpu.dimension_semantics<parallel>], iteration_bounds = array<i64: 1>, scalar_prefetch = 0 : i64, scratch_operands = 0 : i64, tpu.core_type = #tpu.core_type<tc>, window_params = [{transform_indices = @transform_0, window_bounds = array<i64: 1, 8, 128>}, {pipeline_mode = #tpu.pipeline_mode<synchronous>, transform_indices = @transform_1, window_bounds = array<i64: 128, 384>}, {pipeline_mode = #tpu.pipeline_mode<synchronous>, transform_indices = @transform_2, window_bounds = array<i64: 128, 128>}, {pipeline_mode = #tpu.pipeline_mode<synchronous>, transform_indices = @transform_3, window_bounds = array<i64: 1, 128>}, {pipeline_mode = #tpu.pipeline_mode<synchronous>, transform_indices = @transform_4, window_bounds = array<i64: 8, 128>}, {pipeline_mode = #tpu.pipeline_mode<synchronous>, transform_indices = @transform_5, window_bounds = array<i64: 8, 128>}, {pipeline_mode = #tpu.pipeline_mode<synchronous>, transform_indices = @transform_6, window_bounds = array<i64: 256, 256>}, {pipeline_mode = #tpu.pipeline_mode<synchronous>, transform_indices = @transform_7, window_bounds = array<i64: 1, 128>}, {pipeline_mode = #tpu.pipeline_mode<synchronous>, transform_indices = @transform_8, window_bounds = array<i64: 1, 128>}, {transform_indices = @transform_9, window_bounds = array<i64: 1, 8, 128>}]} {
    %c0 = arith.constant 0 : index
    %c0_0 = arith.constant 0 : index
    %c0_1 = arith.constant 0 : index
    %0 = vector.load %arg1[%c0, %c0_0, %c0_1] : memref<1x8x128xf32, #tpu.memory_space<vmem>>, vector<1x8x128xf32>
    %1 = vector.shape_cast %0 : vector<1x8x128xf32> to vector<8x128xf32>
    %c0_2 = arith.constant 0 : index
    %c0_3 = arith.constant 0 : index
    %2 = vector.load %arg2[%c0_2, %c0_3] : memref<128x384xf32, #tpu.memory_space<vmem>>, vector<128x384xf32>
    %cst = arith.constant dense<0.000000e+00> : vector<8x384xf32>
    %3 = tpu.matmul %1, %2, %cst {dimension_numbers = #tpu.dot_dimension_numbers<[1], [0], [0], [1], [0, 0, 1, 1], [], []>} : vector<8x128xf32>, vector<128x384xf32>, vector<8x384xf32> -> vector<8x384xf32>
    %4 = vector.extract_strided_slice %3 {offsets = [0, 0], sizes = [8, 128], strides = [1, 1]} : vector<8x384xf32> to vector<8x128xf32>
    %5 = vector.extract_strided_slice %3 {offsets = [0, 128], sizes = [8, 128], strides = [1, 1]} : vector<8x384xf32> to vector<8x128xf32>
    %6 = vector.extract_strided_slice %3 {offsets = [0, 256], sizes = [8, 128], strides = [1, 1]} : vector<8x384xf32> to vector<8x128xf32>
    %7 = arith.mulf %5, %6 : vector<8x128xf32>
    %8 = vector.shape_cast %7 : vector<8x128xf32> to vector<1x8x128xf32>
    %c0_4 = arith.constant 0 : index
    %c0_5 = arith.constant 0 : index
    %9 = vector.load %arg6[%c0_4, %c0_5] : memref<8x128xf32, #tpu.memory_space<vmem>>, vector<8x128xf32>
    %10 = vector.shape_cast %9 : vector<8x128xf32> to vector<1x8x128xf32>
    %11 = arith.mulf %10, %8 : vector<1x8x128xf32>
    %cst_6 = arith.constant dense<0.000000e+00> : vector<1x128xf32>
    %12 = vector.multi_reduction <add>, %11, %cst_6 [1] : vector<1x8x128xf32> to vector<1x128xf32>
    %13 = arith.mulf %12, %12 : vector<1x128xf32>
    %14 = tpu.concatenate %12, %13 in 1 : vector<1x128xf32>, vector<1x128xf32> -> vector<1x256xf32>
    %c0_7 = arith.constant 0 : index
    %c0_8 = arith.constant 0 : index
    %15 = vector.load %arg7[%c0_7, %c0_8] : memref<256x256xf32, #tpu.memory_space<vmem>>, vector<256x256xf32>
    %cst_9 = arith.constant dense<0.000000e+00> : vector<1x256xf32>
    %16 = tpu.matmul %14, %15, %cst_9 {dimension_numbers = #tpu.dot_dimension_numbers<[1], [0], [0], [1], [0, 0, 1, 1], [], []>} : vector<1x256xf32>, vector<256x256xf32>, vector<1x256xf32> -> vector<1x256xf32>
    %17 = vector.extract_strided_slice %16 {offsets = [0, 0], sizes = [1, 128], strides = [1, 1]} : vector<1x256xf32> to vector<1x128xf32>
    %18 = vector.extract_strided_slice %16 {offsets = [0, 128], sizes = [1, 128], strides = [1, 1]} : vector<1x256xf32> to vector<1x128xf32>
    %19 = arith.mulf %17, %17 : vector<1x128xf32>
    %20 = arith.subf %18, %19 : vector<1x128xf32>
    %cst_10 = arith.constant 0.000000e+00 : f32
    %21 = vector.broadcast %cst_10 : f32 to vector<1x128xf32>
    %22 = arith.maximumf %20, %21 : vector<1x128xf32>
    %23 = arith.subf %12, %17 : vector<1x128xf32>
    %cst_11 = arith.constant 9.99999974E-6 : f32
    %24 = vector.broadcast %cst_11 : f32 to vector<1x128xf32>
    %25 = arith.addf %22, %24 : vector<1x128xf32>
    %26 = math.rsqrt %25 : vector<1x128xf32>
    %27 = arith.mulf %23, %26 : vector<1x128xf32>
    %c0_12 = arith.constant 0 : index
    %c0_13 = arith.constant 0 : index
    %28 = vector.load %arg8[%c0_12, %c0_13] : memref<1x128xf32, #tpu.memory_space<vmem>>, vector<1x128xf32>
    %29 = arith.mulf %27, %28 : vector<1x128xf32>
    %c0_14 = arith.constant 0 : index
    %c0_15 = arith.constant 0 : index
    %30 = vector.load %arg9[%c0_14, %c0_15] : memref<1x128xf32, #tpu.memory_space<vmem>>, vector<1x128xf32>
    %31 = arith.addf %29, %30 : vector<1x128xf32>
    %c0_16 = arith.constant 0 : index
    %c0_17 = arith.constant 0 : index
    %32 = vector.load %arg5[%c0_16, %c0_17] : memref<8x128xf32, #tpu.memory_space<vmem>>, vector<8x128xf32>
    %33 = vector.shape_cast %32 : vector<8x128xf32> to vector<1x8x128xf32>
    %34 = vector.shape_cast %31 : vector<1x128xf32> to vector<1x1x128xf32>
    %35 = vector.broadcast %34 : vector<1x1x128xf32> to vector<1x8x128xf32>
    %36 = arith.mulf %33, %35 : vector<1x8x128xf32>
    %37 = vector.shape_cast %36 : vector<1x8x128xf32> to vector<8x128xf32>
    %38 = arith.mulf %4, %37 : vector<8x128xf32>
    %c0_18 = arith.constant 0 : index
    %c0_19 = arith.constant 0 : index
    %39 = vector.load %arg3[%c0_18, %c0_19] : memref<128x128xf32, #tpu.memory_space<vmem>>, vector<128x128xf32>
    %cst_20 = arith.constant dense<0.000000e+00> : vector<8x128xf32>
    %40 = tpu.matmul %38, %39, %cst_20 {dimension_numbers = #tpu.dot_dimension_numbers<[1], [0], [0], [1], [0, 0, 1, 1], [], []>} : vector<8x128xf32>, vector<128x128xf32>, vector<8x128xf32> -> vector<8x128xf32>
    %c0_21 = arith.constant 0 : index
    %c0_22 = arith.constant 0 : index
    %41 = vector.load %arg4[%c0_21, %c0_22] : memref<1x128xf32, #tpu.memory_space<vmem>>, vector<1x128xf32>
    %42 = vector.broadcast %41 : vector<1x128xf32> to vector<8x128xf32>
    %43 = arith.addf %40, %42 : vector<8x128xf32>
    %44 = vector.shape_cast %43 : vector<8x128xf32> to vector<1x8x128xf32>
    %c0_23 = arith.constant 0 : index
    %c0_24 = arith.constant 0 : index
    %c0_25 = arith.constant 0 : index
    %45 = vector.load %arg10[%c0_23, %c0_24, %c0_25] : memref<1x8x128xf32, #tpu.memory_space<vmem>>, vector<1x8x128xf32>
    tpu.vector_store %arg10[%c0_23, %c0_24, %c0_25], %44 {strides = array<i32>} : memref<1x8x128xf32, #tpu.memory_space<vmem>>, vector<1x8x128xf32>,
    return
  }
  func.func @transform_0(%arg0: i32) -> (i32, i32, i32) {
    %c0_i32 = arith.constant 0 : i32
    %c0_i32_0 = arith.constant 0 : i32
    %c0_i32_1 = arith.constant 0 : i32
    return %arg0, %c0_i32, %c0_i32_0 : i32, i32, i32
  }
  func.func @transform_1(%arg0: i32) -> (i32, i32) {
    %c0_i32 = arith.constant 0 : i32
    %c0_i32_0 = arith.constant 0 : i32
    %c0_i32_1 = arith.constant 0 : i32
    return %c0_i32, %c0_i32_0 : i32, i32
  }
  func.func @transform_2(%arg0: i32) -> (i32, i32) {
    %c0_i32 = arith.constant 0 : i32
    %c0_i32_0 = arith.constant 0 : i32
    %c0_i32_1 = arith.constant 0 : i32
    return %c0_i32, %c0_i32_0 : i32, i32
  }
  func.func @transform_3(%arg0: i32) -> (i32, i32) {
    %c0_i32 = arith.constant 0 : i32
    %c0_i32_0 = arith.constant 0 : i32
    %c0_i32_1 = arith.constant 0 : i32
    return %c0_i32, %c0_i32_0 : i32, i32
  }
  func.func @transform_4(%arg0: i32) -> (i32, i32) {
    %c0_i32 = arith.constant 0 : i32
    %c0_i32_0 = arith.constant 0 : i32
    %c0_i32_1 = arith.constant 0 : i32
    return %c0_i32, %c0_i32_0 : i32, i32
  }
  func.func @transform_5(%arg0: i32) -> (i32, i32) {
    %c0_i32 = arith.constant 0 : i32
    %c0_i32_0 = arith.constant 0 : i32
    %c0_i32_1 = arith.constant 0 : i32
    return %c0_i32, %c0_i32_0 : i32, i32
  }
  func.func @transform_6(%arg0: i32) -> (i32, i32) {
    %c0_i32 = arith.constant 0 : i32
    %c0_i32_0 = arith.constant 0 : i32
    %c0_i32_1 = arith.constant 0 : i32
    return %c0_i32, %c0_i32_0 : i32, i32
  }
  func.func @transform_7(%arg0: i32) -> (i32, i32) {
    %c0_i32 = arith.constant 0 : i32
    %c0_i32_0 = arith.constant 0 : i32
    %c0_i32_1 = arith.constant 0 : i32
    return %c0_i32, %c0_i32_0 : i32, i32
  }
  func.func @transform_8(%arg0: i32) -> (i32, i32) {
    %c0_i32 = arith.constant 0 : i32
    %c0_i32_0 = arith.constant 0 : i32
    %c0_i32_1 = arith.constant 0 : i32
    return %c0_i32, %c0_i32_0 : i32, i32
  }
  func.func @transform_9(%arg0: i32) -> (i32, i32, i32) {
    %c0_i32 = arith.constant 0 : i32
    %c0_i32_0 = arith.constant 0 : i32
    %c0_i32_1 = arith.constant 0 : i32
    return %arg0, %c0_i32, %c0_i32_0 : i32, i32, i32
  }
}

</mosaic_0001>

<bundles_post_ra>
// kernel: tpu_custom_call.1
= control target key start
LH: loop header
LB: loop body
LE: loop exit
PB: predicated region body
PF: predicated region fallthrough
CT: control target
= control target key end

     0   :  { %14 = vsyncpa [#allocation3], 0  ;;  %s950_s0 = inlined_call_operand.hbm [shape: f32[1,8,128], index: 0, kind: input, shape index: {}]   ;;  %s951_s1 = inlined_call_operand.hbm [shape: f32[128,384], index: 1, kind: input, shape index: {}]   ;;  %s952_s2 = inlined_call_operand.hbm [shape: f32[128,128], index: 2, kind: input, shape index: {}]   ;;  %s953_s3 = inlined_call_operand.vmem [shape: f32[1,128], index: 3, kind: input, shape index: {}]   ;;  %s954_s4 = inlined_call_operand.hbm [shape: f32[8,128], index: 4, kind: input, shape index: {}]   ;;  %s955_s5 = inlined_call_operand.vmem [shape: f32[8,128], index: 5, kind: input, shape index: {}]   ;;  %s956_s6 = inlined_call_operand.hbm [shape: f32[256,256], index: 6, kind: input, shape index: {}]   ;;  %s957_s7 = inlined_call_operand.vmem [shape: f32[1,128], index: 7, kind: input, shape index: {}]   ;;  %s958_s8 = inlined_call_operand.vmem [shape: f32[1,128], index: 8, kind: input, shape index: {}]   ;;  %s959_s9 = inlined_call_operand.hbm [shape: f32[1,8,128], index: 9, kind: output, shape index: {}]  }
   0x1   :  { %15 = vsyncpa [#allocation6], 0 }
   0x2   :  { %16 = vsyncpa [#allocation9], 0 }
   0x3   :  { %17 = vsyncpa [#allocation4], 0  ;;  %s810_s30 = smov [#allocation5]  }
   0x4   :  { %s33_s10 = sshll.u32 %s810_s30, 4  ;;  %s34_s10 = int_to_ptr.vmem [resolvable:$true] %s33_s10 }
   0x5   :  { %s690_s11 = scalar_lea.vmem %s34_s10, 6144  ;;  %p695_p1 = scmp.lt.s32.totalorder %s34_s10, %s34_s10 }
   0x6   :  { %p691_p0 = scmp.ne.s32.totalorder %s34_s10, %s690_s11  ;;  %p696_p2 = scmp.lt.s32.totalorder %s690_s11, %s690_s11 }
   0x8   :  { %p697_p3 = por %p696_p2, %p695_p1 }
   0xa   :  { %p698_p4 = pnand %p697_p3, %p691_p0 }
   0xc   :  { %701 = shalt.err (!%p698_p4)
}
   0xd   :  { %s811_s12 = smov 384   ;;  %s812_s13 = smov 24  }
   0xe   :  { %39 = dma.hbm_to_vmem [thread:$0]  %s951_s1, 6144, %s34_s10, [#allocation6], %s811_s12, %s811_s12, %s812_s13  }
   0xf   :  { %s813_s16 = smov [#allocation8]   ;;  %s814_s18 = smov [#allocation2]  }
  0x10   :  { %s60_s17 = sshll.u32 %s813_s16, 4  ;;  %s24_s19 = sshll.u32 %s814_s18, 4  ;;  %s61_s17 = int_to_ptr.vmem [resolvable:$true] %s60_s17  ;;  %s25_s19 = int_to_ptr.vmem [resolvable:$true] %s24_s19 }
  0x11   :  { %s710_s20 = scalar_lea.vmem %s61_s17, 128  ;;  %p715_p6 = scmp.lt.s32.totalorder %s61_s17, %s61_s17 }
  0x12   :  { %p711_p5 = scmp.ne.s32.totalorder %s61_s17, %s710_s20  ;;  %p716_p7 = scmp.lt.s32.totalorder %s710_s20, %s710_s20 }
  0x14   :  { %p717_p8 = por %p716_p7, %p715_p6 }
  0x16   :  { %p718_p9 = pnand %p717_p8, %p711_p5 }
  0x18   :  { %721 = shalt.err (!%p718_p9)
}
  0x19   :  { %63 = dma.hbm_to_vmem [thread:$0]  %s954_s4, 128, %s61_s17, [#allocation9]  }
  0x1a   :  { %s730_s23 = scalar_lea.vmem %s25_s19, 128  ;;  %p735_p11 = scmp.lt.s32.totalorder %s25_s19, %s25_s19 }
  0x1b   :  { %p731_p10 = scmp.ne.s32.totalorder %s25_s19, %s730_s23  ;;  %p736_p12 = scmp.lt.s32.totalorder %s730_s23, %s730_s23 }
  0x1d   :  { %p737_p13 = por %p736_p12, %p735_p11 }
  0x1f   :  { %p738_p0 = pnand %p737_p13, %p731_p10 }
  0x21   :  { %741 = shalt.err (!%p738_p0)
}
  0x22   :  { %27 = dma.hbm_to_vmem [thread:$0]  %s950_s0, 128, %s25_s19, [#allocation3]  }
  0x23   :  { %s815_s25 = smov [#allocation7]  }
  0x24   :  { %s45_s26 = sshll.u32 %s815_s25, 4  ;;  %s46_s26 = int_to_ptr.vmem [resolvable:$true] %s45_s26 }
  0x25   :  { %s750_s27 = scalar_lea.vmem %s46_s26, 2048  ;;  %p755_p2 = scmp.lt.s32.totalorder %s46_s26, %s46_s26 }
  0x26   :  { %p751_p1 = scmp.ne.s32.totalorder %s46_s26, %s750_s27  ;;  %p756_p3 = scmp.lt.s32.totalorder %s750_s27, %s750_s27 }
  0x28   :  { %p757_p4 = por %p756_p3, %p755_p2 }
  0x2a   :  { %p758_p5 = pnand %p757_p4, %p751_p1 }
  0x2c   :  { %761 = shalt.err (!%p758_p5)
}
  0x2d   :  { %s816_s4 = smov 128   ;;  %s817_s28 = smov 8  }
  0x2e   :  { %51 = dma.hbm_to_vmem [thread:$0]  %s952_s2, 2048, %s46_s26, [#allocation6], %s816_s4, %s816_s4, %s817_s28  }
  0x2f   :  { %s818_s10 = smov [#allocation10]  }
  0x30   :  { %s71_s11 = sshll.u32 %s818_s10, 4  ;;  %s72_s11 = int_to_ptr.vmem [resolvable:$true] %s71_s11 }
  0x31   :  { %s770_s0 = scalar_lea.vmem %s72_s11, 8192  ;;  %p775_p7 = scmp.lt.s32.totalorder %s72_s11, %s72_s11 }
  0x32   :  { %p771_p6 = scmp.ne.s32.totalorder %s72_s11, %s770_s0  ;;  %p776_p8 = scmp.lt.s32.totalorder %s770_s0, %s770_s0 }
  0x34   :  { %p777_p9 = por %p776_p8, %p775_p7 }
  0x36   :  { %p778_p10 = pnand %p777_p9, %p771_p6 }
  0x38   :  { %781 = shalt.err (!%p778_p10)
}
  0x39   :  { %s819_s12 = smov 256   ;;  %s820_s13 = smov 16  }
  0x3a   :  { %77 = dma.hbm_to_vmem [thread:$0]  %s956_s6, 8192, %s72_s11, [#allocation9], %s819_s12, %s819_s12, %s820_s13  }
  0x3b   :  { %802 = dma.done.wait [#allocation3], 128  }
  0x3c   :  { %803 = vsyncadd [#allocation3], 4294967168 }
  0x3d   :  { %804 = dma.done.wait [#allocation6], 8192  }
  0x3e   :  { %805 = vsyncadd [#allocation6], 4294959104 }
  0x3f   :  { %806 = dma.done.wait [#allocation9], 8320  }
  0x40   :  { %807 = vsyncadd [#allocation9], 4294958976  ;;  %v821_v0 = vmov 0.0   ;;  %vm822_vm0 = vmmov 0   ;;  %v144_v1 = vld [vmem:[#allocation5 + $0x170] sm:$0xff]  ;;  %v143_v2 = vld [vmem:[#allocation5 + $0x168] sm:$0xff] }
  0x41   :  { %596 = vmatprep.subr.mxu1 %v821_v0  ;;  %210 = vmatprep.mubr.f32.mxu0 %v821_v0  ;;  %v145_v3 = vld [vmem:[#allocation5 + $0x178] sm:$0xff]  ;;  %v140_v5 = vld [vmem:[#allocation5 + $0x150] sm:$0xff]  ;;  %v142_v6 = vld [vmem:[#allocation5 + $0x160] sm:$0xff]  ;;  %s823_s21 = smov [#allocation11]  }
  0x42   :  { %628 = vmatprep.mubr.msk.f32.mxu1 %vm822_vm0, %v821_v0  ;;  %146 = vmatprep.subr.mxu0 %v144_v1  ;;  %v141_v4 = vld [vmem:[#allocation5 + $0x158] sm:$0xff]  ;;  %v138_v7 = vld [vmem:[#allocation5 + $0x140] sm:$0xff]  ;;  %v139_v8 = vld [vmem:[#allocation5 + $0x148] sm:$0xff] }
  0x43   :  { %597 = vmatpush3.msra.mxu1 %v145_v3  ;;  %147 = vmatpush1.msra.mxu0 %v143_v2  ;;  %v137_v9 = vld [vmem:[#allocation5 + $0x138] sm:$0xff]  ;;  %v135_v10 = vld [vmem:[#allocation5 + $0x128] sm:$0xff]  ;;  %v136_v11 = vld [vmem:[#allocation5 + $0x130] sm:$0xff] }
  0x44   :  { %598 = vmatprep.subr.mxu1 %v821_v0  ;;  %148 = vmatprep.subr.mxu0 %v141_v4  ;;  %v134_v12 = vld [vmem:[#allocation5 + $0x120] sm:$0xff]  ;;  %v132_v13 = vld [vmem:[#allocation5 + $0x110] sm:$0xff]  ;;  %v133_v14 = vld [vmem:[#allocation5 + $0x118] sm:$0xff] }
  0x45   :  { %599 = vmatpush3.msra.mxu1 %v142_v6  ;;  %149 = vmatpush1.msra.mxu0 %v140_v5  ;;  %v131_v15 = vld [vmem:[#allocation5 + $0x108] sm:$0xff]  ;;  %v129_v16 = vld [vmem:[#allocation5 + $0xf8] sm:$0xff]  ;;  %v130_v17 = vld [vmem:[#allocation5 + $0x100] sm:$0xff] }
  0x46   :  { %600 = vmatprep.subr.mxu1 %v821_v0  ;;  %150 = vmatprep.subr.mxu0 %v138_v7  ;;  %v128_v18 = vld [vmem:[#allocation5 + $0xf0] sm:$0xff]  ;;  %v126_v19 = vld [vmem:[#allocation5 + $0xe0] sm:$0xff]  ;;  %v127_v20 = vld [vmem:[#allocation5 + $0xe8] sm:$0xff] }
  0x47   :  { %601 = vmatpush3.msra.mxu1 %v139_v8  ;;  %151 = vmatpush1.msra.mxu0 %v137_v9  ;;  %v125_v21 = vld [vmem:[#allocation5 + $0xd8] sm:$0xff]  ;;  %v123_v22 = vld [vmem:[#allocation5 + $0xc8] sm:$0xff]  ;;  %v124_v23 = vld [vmem:[#allocation5 + $0xd0] sm:$0xff] }
  0x48   :  { %602 = vmatprep.subr.mxu1 %v821_v0  ;;  %152 = vmatprep.subr.mxu0 %v135_v10  ;;  %v122_v24 = vld [vmem:[#allocation5 + $0xc0] sm:$0xff]  ;;  %v120_v25 = vld [vmem:[#allocation5 + $0xb0] sm:$0xff]  ;;  %v121_v26 = vld [vmem:[#allocation5 + $0xb8] sm:$0xff] }
  0x49   :  { %603 = vmatpush3.msra.mxu1 %v136_v11  ;;  %153 = vmatpush1.msra.mxu0 %v134_v12  ;;  %v119_v27 = vld [vmem:[#allocation5 + $0xa8] sm:$0xff]  ;;  %v117_v28 = vld [vmem:[#allocation5 + $0x98] sm:$0xff]  ;;  %v118_v29 = vld [vmem:[#allocation5 + $0xa0] sm:$0xff] }
  0x4a   :  { %604 = vmatprep.subr.mxu1 %v821_v0  ;;  %154 = vmatprep.subr.mxu0 %v132_v13  ;;  %v116_v30 = vld [vmem:[#allocation5 + $0x90] sm:$0xff]  ;;  %v114_v31 = vld [vmem:[#allocation5 + $0x80] sm:$0xff]  ;;  %v115_v32 = vld [vmem:[#allocation5 + $0x88] sm:$0xff] }
  0x4b   :  { %605 = vmatpush3.msra.mxu1 %v133_v14  ;;  %155 = vmatpush1.msra.mxu0 %v131_v15  ;;  %v113_v33 = vld [vmem:[#allocation5 + $0x78] sm:$0xff]  ;;  %v111_v34 = vld [vmem:[#allocation5 + $0x68] sm:$0xff]  ;;  %v112_v35 = vld [vmem:[#allocation5 + $0x70] sm:$0xff] }
  0x4c   :  { %606 = vmatprep.subr.mxu1 %v821_v0  ;;  %156 = vmatprep.subr.mxu0 %v129_v16  ;;  %v110_v36 = vld [vmem:[#allocation5 + $0x60] sm:$0xff]  ;;  %v108_v37 = vld [vmem:[#allocation5 + $0x50] sm:$0xff]  ;;  %v109_v38 = vld [vmem:[#allocation5 + $0x58] sm:$0xff] }
  0x4d   :  { %607 = vmatpush3.msra.mxu1 %v130_v17  ;;  %157 = vmatpush1.msra.mxu0 %v128_v18  ;;  %v107_v39 = vld [vmem:[#allocation5 + $0x48] sm:$0xff]  ;;  %v105_v40 = vld [vmem:[#allocation5 + $0x38] sm:$0xff]  ;;  %v106_v41 = vld [vmem:[#allocation5 + $0x40] sm:$0xff] }
  0x4e   :  { %608 = vmatprep.subr.mxu1 %v821_v0  ;;  %158 = vmatprep.subr.mxu0 %v126_v19  ;;  %v104_v42 = vld [vmem:[#allocation5 + $0x30] sm:$0xff]  ;;  %v102_v43 = vld [vmem:[#allocation5 + $0x20] sm:$0xff]  ;;  %v103_v44 = vld [vmem:[#allocation5 + $0x28] sm:$0xff] }
  0x4f   :  { %609 = vmatpush3.msra.mxu1 %v127_v20  ;;  %159 = vmatpush1.msra.mxu0 %v125_v21  ;;  %v101_v45 = vld [vmem:[#allocation5 + $0x18] sm:$0xff]  ;;  %v99_v46 = vld [vmem:[#allocation5 + $0x8] sm:$0xff]  ;;  %v100_v47 = vld [vmem:[#allocation5 + $0x10] sm:$0xff] }
  0x50   :  { %610 = vmatprep.subr.mxu1 %v821_v0  ;;  %160 = vmatprep.subr.mxu0 %v123_v22  ;;  %v98_v48 = vld [vmem:[#allocation5] sm:$0xff]  ;;  %v97_v49 = vld [vmem:[#allocation2] sm:$0xff]  ;;  %v326_v52 = vld [vmem:[#allocation10 + $0xe8] sm:$0xff] }
  0x51   :  { %611 = vmatpush3.msra.mxu1 %v124_v23  ;;  %161 = vmatpush1.msra.mxu0 %v122_v24  ;;  %v328_v50 = vld [vmem:[#allocation10 + $0xf8] sm:$0xff]  ;;  %v327_v51 = vld [vmem:[#allocation10 + $0xf0] sm:$0xff]  ;;  %v325_v53 = vld [vmem:[#allocation10 + $0xe0] sm:$0xff] }
  0x52   :  { %612 = vmatprep.subr.mxu1 %v821_v0  ;;  %162 = vmatprep.subr.mxu0 %v120_v25  ;;  %v324_v54 = vld [vmem:[#allocation10 + $0xd8] sm:$0xff]  ;;  %v323_v55 = vld [vmem:[#allocation10 + $0xd0] sm:$0xff]  ;;  %v322_v56 = vld [vmem:[#allocation10 + $0xc8] sm:$0xff] }
  0x53   :  { %613 = vmatpush3.msra.mxu1 %v121_v26  ;;  %163 = vmatpush1.msra.mxu0 %v119_v27  ;;  %v321_v57 = vld [vmem:[#allocation10 + $0xc0] sm:$0xff]  ;;  %v320_v58 = vld [vmem:[#allocation10 + $0xb8] sm:$0xff]  ;;  %v319_v59 = vld [vmem:[#allocation10 + $0xb0] sm:$0xff] }
  0x54   :  { %614 = vmatprep.subr.mxu1 %v821_v0  ;;  %164 = vmatprep.subr.mxu0 %v117_v28  ;;  %v318_v60 = vld [vmem:[#allocation10 + $0xa8] sm:$0xff]  ;;  %v317_v61 = vld [vmem:[#allocation10 + $0xa0] sm:$0xff]  ;;  %v316_v62 = vld [vmem:[#allocation10 + $0x98] sm:$0xff] }
  0x55   :  { %615 = vmatpush3.msra.mxu1 %v118_v29  ;;  %165 = vmatpush1.msra.mxu0 %v116_v30  ;;  %v315_v63 = vld [vmem:[#allocation10 + $0x90] sm:$0xff]  ;;  %v314_v1 = vld [vmem:[#allocation10 + $0x88] sm:$0xff]  ;;  %v313_v2 = vld [vmem:[#allocation10 + $0x80] sm:$0xff] }
  0x56   :  { %616 = vmatprep.subr.mxu1 %v821_v0  ;;  %166 = vmatprep.subr.mxu0 %v114_v31  ;;  %v312_v3 = vld [vmem:[#allocation10 + $0x78] sm:$0xff]  ;;  %v311_v4 = vld [vmem:[#allocation10 + $0x70] sm:$0xff]  ;;  %v310_v5 = vld [vmem:[#allocation10 + $0x68] sm:$0xff] }
  0x57   :  { %617 = vmatpush3.msra.mxu1 %v115_v32  ;;  %167 = vmatpush1.msra.mxu0 %v113_v33  ;;  %v309_v6 = vld [vmem:[#allocation10 + $0x60] sm:$0xff]  ;;  %v308_v7 = vld [vmem:[#allocation10 + $0x58] sm:$0xff]  ;;  %v307_v8 = vld [vmem:[#allocation10 + $0x50] sm:$0xff] }
  0x58   :  { %618 = vmatprep.subr.mxu1 %v821_v0  ;;  %168 = vmatprep.subr.mxu0 %v111_v34  ;;  %v306_v9 = vld [vmem:[#allocation10 + $0x48] sm:$0xff]  ;;  %v305_v10 = vld [vmem:[#allocation10 + $0x40] sm:$0xff]  ;;  %v304_v11 = vld [vmem:[#allocation10 + $0x38] sm:$0xff] }
  0x59   :  { %619 = vmatpush3.msra.mxu1 %v112_v35  ;;  %169 = vmatpush1.msra.mxu0 %v110_v36  ;;  %v303_v12 = vld [vmem:[#allocation10 + $0x30] sm:$0xff]  ;;  %v302_v13 = vld [vmem:[#allocation10 + $0x28] sm:$0xff]  ;;  %v301_v14 = vld [vmem:[#allocation10 + $0x20] sm:$0xff] }
  0x5a   :  { %620 = vmatprep.subr.mxu1 %v821_v0  ;;  %170 = vmatprep.subr.mxu0 %v108_v37  ;;  %v300_v15 = vld [vmem:[#allocation10 + $0x18] sm:$0xff]  ;;  %v299_v16 = vld [vmem:[#allocation10 + $0x10] sm:$0xff]  ;;  %v298_v17 = vld [vmem:[#allocation10 + $0x8] sm:$0xff] }
  0x5b   :  { %621 = vmatpush3.msra.mxu1 %v109_v38  ;;  %171 = vmatpush1.msra.mxu0 %v107_v39  ;;  %v297_v18 = vld [vmem:[#allocation10] sm:$0xff]  ;;  %v360_v19 = vld [vmem:[#allocation10 + $0x1f8] sm:$0xff]  ;;  %v359_v20 = vld [vmem:[#allocation10 + $0x1f0] sm:$0xff] }
  0x5c   :  { %622 = vmatprep.subr.mxu1 %v821_v0  ;;  %172 = vmatprep.subr.mxu0 %v105_v40  ;;  %v358_v21 = vld [vmem:[#allocation10 + $0x1e8] sm:$0xff]  ;;  %v357_v22 = vld [vmem:[#allocation10 + $0x1e0] sm:$0xff]  ;;  %v356_v23 = vld [vmem:[#allocation10 + $0x1d8] sm:$0xff] }
  0x5d   :  { %623 = vmatpush3.msra.mxu1 %v106_v41  ;;  %173 = vmatpush1.msra.mxu0 %v104_v42  ;;  %v355_v24 = vld [vmem:[#allocation10 + $0x1d0] sm:$0xff]  ;;  %v354_v25 = vld [vmem:[#allocation10 + $0x1c8] sm:$0xff]  ;;  %v353_v26 = vld [vmem:[#allocation10 + $0x1c0] sm:$0xff] }
  0x5e   :  { %624 = vmatprep.subr.mxu1 %v821_v0  ;;  %174 = vmatprep.subr.mxu0 %v102_v43  ;;  %v352_v27 = vld [vmem:[#allocation10 + $0x1b8] sm:$0xff]  ;;  %v351_v28 = vld [vmem:[#allocation10 + $0x1b0] sm:$0xff]  ;;  %v350_v29 = vld [vmem:[#allocation10 + $0x1a8] sm:$0xff] }
  0x5f   :  { %625 = vmatpush3.msra.mxu1 %v103_v44  ;;  %175 = vmatpush1.msra.mxu0 %v101_v45  ;;  %v349_v30 = vld [vmem:[#allocation10 + $0x1a0] sm:$0xff]  ;;  %v348_v31 = vld [vmem:[#allocation10 + $0x198] sm:$0xff]  ;;  %v347_v32 = vld [vmem:[#allocation10 + $0x190] sm:$0xff] }
  0x60   :  { %626 = vmatprep.subr.mxu1 %v821_v0  ;;  %176 = vmatprep.subr.mxu0 %v99_v46  ;;  %v346_v33 = vld [vmem:[#allocation10 + $0x188] sm:$0xff]  ;;  %v345_v34 = vld [vmem:[#allocation10 + $0x180] sm:$0xff]  ;;  %v344_v35 = vld [vmem:[#allocation10 + $0x178] sm:$0xff] }
  0x61   :  { %627 = vmatpush3.msra.mxu1 %v100_v47  ;;  %177 = vmatpush1.msra.mxu0 %v98_v48  ;;  %v343_v36 = vld [vmem:[#allocation10 + $0x170] sm:$0xff]  ;;  %v342_v37 = vld [vmem:[#allocation10 + $0x168] sm:$0xff]  ;;  %v341_v38 = vld [vmem:[#allocation10 + $0x160] sm:$0xff] }
  0x62   :  { %629 = vmatmul.mubr.f32.vlgmr.msra.gmra.mxu1 %v97_v49  ;;  %211 = vmatmul.mubr.f32.vlgmr.msra.gmra.mxu0 %v97_v49  ;;  %v340_v39 = vld [vmem:[#allocation10 + $0x158] sm:$0xff]  ;;  %v339_v40 = vld [vmem:[#allocation10 + $0x150] sm:$0xff]  ;;  %v338_v41 = vld [vmem:[#allocation10 + $0x148] sm:$0xff] }
  0x63   :  { %361 = vmatprep.subr.mxu0 %v328_v50  ;;  %631 = vmatprep.subr.mxu1 %v821_v0  ;;  %v337_v42 = vld [vmem:[#allocation10 + $0x140] sm:$0xff]  ;;  %v336_v43 = vld [vmem:[#allocation10 + $0x138] sm:$0xff]  ;;  %v335_v44 = vld [vmem:[#allocation10 + $0x130] sm:$0xff] }
  0x64   :  { %362 = vmatpush1.msra.mxu0 %v327_v51  ;;  %663 = vmatprep.mubr.msk.f32.mxu1 %vm822_vm0, %v821_v0  ;;  %v334_v45 = vld [vmem:[#allocation10 + $0x128] sm:$0xff]  ;;  %v333_v46 = vld [vmem:[#allocation10 + $0x120] sm:$0xff]  ;;  %v332_v47 = vld [vmem:[#allocation10 + $0x118] sm:$0xff] }
  0x65   :  { %363 = vmatprep.subr.mxu0 %v326_v52  ;;  %v331_v48 = vld [vmem:[#allocation10 + $0x110] sm:$0xff]  ;;  %v330_v49 = vld [vmem:[#allocation10 + $0x108] sm:$0xff]  ;;  %v329_v50 = vld [vmem:[#allocation10 + $0x100] sm:$0xff] }
  0x66   :  { %364 = vmatpush1.msra.mxu0 %v325_v53 }
  0x67   :  { %365 = vmatprep.subr.mxu0 %v324_v54 }
  0x68   :  { %366 = vmatpush1.msra.mxu0 %v323_v55  ;;  %v288_v55 = vld [vmem:[%s955_s5] sm:$0xff] }
  0x69   :  { %367 = vmatprep.subr.mxu0 %v322_v56 }
  0x6a   :  { %368 = vmatpush1.msra.mxu0 %v321_v57 }
  0x6b   :  { %369 = vmatprep.subr.mxu0 %v320_v58 }
  0x6c   :  { %370 = vmatpush1.msra.mxu0 %v319_v59 }
  0x6d   :  { %371 = vmatprep.subr.mxu0 %v318_v60 }
  0x6e   :  { %372 = vmatpush1.msra.mxu0 %v317_v61 }
  0x6f   :  { %373 = vmatprep.subr.mxu0 %v316_v62 }
  0x70   :  { %374 = vmatpush1.msra.mxu0 %v315_v63 }
  0x71   :  { %375 = vmatprep.subr.mxu0 %v314_v1 }
  0x72   :  { %376 = vmatpush1.msra.mxu0 %v313_v2  ;;  %v465_v2 = vld [vmem:[#allocation7 + $0x78] sm:$0xff] }
  0x73   :  { %377 = vmatprep.subr.mxu0 %v312_v3  ;;  %632 = vmatpush3.msra.mxu1 %v465_v2  ;;  %v464_v3 = vld [vmem:[#allocation7 + $0x70] sm:$0xff] }
  0x74   :  { %378 = vmatpush1.msra.mxu0 %v311_v4  ;;  %633 = vmatprep.subr.mxu1 %v821_v0  ;;  %v463_v4 = vld [vmem:[#allocation7 + $0x68] sm:$0xff] }
  0x75   :  { %379 = vmatprep.subr.mxu0 %v310_v5  ;;  %634 = vmatpush3.msra.mxu1 %v464_v3  ;;  %v462_v5 = vld [vmem:[#allocation7 + $0x60] sm:$0xff] }
  0x76   :  { %380 = vmatpush1.msra.mxu0 %v309_v6  ;;  %635 = vmatprep.subr.mxu1 %v821_v0  ;;  %v461_v6 = vld [vmem:[#allocation7 + $0x58] sm:$0xff] }
  0x77   :  { %381 = vmatprep.subr.mxu0 %v308_v7  ;;  %636 = vmatpush3.msra.mxu1 %v463_v4  ;;  %v460_v7 = vld [vmem:[#allocation7 + $0x50] sm:$0xff] }
  0x78   :  { %382 = vmatpush1.msra.mxu0 %v307_v8  ;;  %637 = vmatprep.subr.mxu1 %v821_v0  ;;  %v459_v8 = vld [vmem:[#allocation7 + $0x48] sm:$0xff] }
  0x79   :  { %383 = vmatprep.subr.mxu0 %v306_v9  ;;  %638 = vmatpush3.msra.mxu1 %v462_v5  ;;  %v458_v9 = vld [vmem:[#allocation7 + $0x40] sm:$0xff] }
  0x7a   :  { %384 = vmatpush1.msra.mxu0 %v305_v10  ;;  %639 = vmatprep.subr.mxu1 %v821_v0  ;;  %v457_v10 = vld [vmem:[#allocation7 + $0x38] sm:$0xff] }
  0x7b   :  { %385 = vmatprep.subr.mxu0 %v304_v11  ;;  %640 = vmatpush3.msra.mxu1 %v461_v6  ;;  %v456_v11 = vld [vmem:[#allocation7 + $0x30] sm:$0xff] }
  0x7c   :  { %386 = vmatpush1.msra.mxu0 %v303_v12  ;;  %641 = vmatprep.subr.mxu1 %v821_v0  ;;  %v455_v12 = vld [vmem:[#allocation7 + $0x28] sm:$0xff] }
  0x7d   :  { %387 = vmatprep.subr.mxu0 %v302_v13  ;;  %642 = vmatpush3.msra.mxu1 %v460_v7  ;;  %v454_v13 = vld [vmem:[#allocation7 + $0x20] sm:$0xff] }
  0x7e   :  { %388 = vmatpush1.msra.mxu0 %v301_v14  ;;  %643 = vmatprep.subr.mxu1 %v821_v0  ;;  %v453_v14 = vld [vmem:[#allocation7 + $0x18] sm:$0xff] }
  0x7f   :  { %389 = vmatprep.subr.mxu0 %v300_v15  ;;  %644 = vmatpush3.msra.mxu1 %v459_v8  ;;  %v452_v15 = vld [vmem:[#allocation7 + $0x10] sm:$0xff] }
  0x80   :  { %390 = vmatpush1.msra.mxu0 %v299_v16  ;;  %645 = vmatprep.subr.mxu1 %v821_v0  ;;  %v451_v16 = vld [vmem:[#allocation7 + $0x8] sm:$0xff] }
  0x81   :  { %391 = vmatprep.subr.mxu0 %v298_v17  ;;  %646 = vmatpush3.msra.mxu1 %v458_v9  ;;  %v450_v17 = vld [vmem:[#allocation7] sm:$0xff] }
  0x82   :  { %392 = vmatpush1.msra.mxu0 %v297_v18  ;;  %647 = vmatprep.subr.mxu1 %v821_v0 }
  0x83   :  { %393 = vmatprep.subr.mxu0 %v360_v19  ;;  %648 = vmatpush3.msra.mxu1 %v457_v10 }
  0x84   :  { %394 = vmatpush2.msra.mxu0 %v359_v20  ;;  %649 = vmatprep.subr.mxu1 %v821_v0 }
  0x85   :  { %395 = vmatprep.subr.mxu0 %v358_v21  ;;  %650 = vmatpush3.msra.mxu1 %v456_v11 }
  0x86   :  { %396 = vmatpush2.msra.mxu0 %v357_v22  ;;  %651 = vmatprep.subr.mxu1 %v821_v0 }
  0x87   :  { %397 = vmatprep.subr.mxu0 %v356_v23  ;;  %652 = vmatpush3.msra.mxu1 %v455_v12 }
  0x88   :  { %398 = vmatpush2.msra.mxu0 %v355_v24  ;;  %653 = vmatprep.subr.mxu1 %v821_v0  ;;  %v444_v24 = vlaneseq }
  0x89   :  { %399 = vmatprep.subr.mxu0 %v354_v25  ;;  %654 = vmatpush3.msra.mxu1 %v454_v13 }
  0x8a   :  { %400 = vmatpush2.msra.mxu0 %v353_v26  ;;  %655 = vmatprep.subr.mxu1 %v821_v0  ;;  %v445_v26 = vshrl.u32 %v444_v24, 7 }
  0x8b   :  { %401 = vmatprep.subr.mxu0 %v352_v27  ;;  %656 = vmatpush3.msra.mxu1 %v453_v14 }
  0x8c   :  { %402 = vmatpush2.msra.mxu0 %v351_v28  ;;  %657 = vmatprep.subr.mxu1 %v821_v0  ;;  %v439_v28 = vld [vmem:[%s957_s7] sm:$0x1]  ;;  %s550_s7 = sshll.u32 %s823_s21, 4  ;;  %s551_s7 = int_to_ptr.vmem [resolvable:$true] %s550_s7 }
  0x8d   :  { %403 = vmatprep.subr.mxu0 %v350_v29  ;;  %658 = vmatpush3.msra.mxu1 %v452_v15  ;;  %p787_p12 = scmp.lt.s32.totalorder %s551_s7, %s551_s7 }
  0x8e   :  { %404 = vmatpush2.msra.mxu0 %v349_v30  ;;  %659 = vmatprep.subr.mxu1 %v821_v0 }
  0x8f   :  { %405 = vmatprep.subr.mxu0 %v348_v31  ;;  %660 = vmatpush3.msra.mxu1 %v451_v16  ;;  %v446_v31 = vsub.s32 0, %v445_v26 }
  0x90   :  { %406 = vmatpush2.msra.mxu0 %v347_v32  ;;  %661 = vmatprep.subr.mxu1 %v821_v0  ;;  %v441_v0 = vld [vmem:[%s958_s8] sm:$0x1]  ;;  %s782_s8 = scalar_lea.vmem %s551_s7, 128 }
  0x91   :  { %407 = vmatprep.subr.mxu0 %v346_v33  ;;  %662 = vmatpush3.msra.mxu1 %v450_v17  ;;  %v443_v33 = vld [vmem:[#allocation8] sm:$0xff]  ;;  %p783_p11 = scmp.ne.s32.totalorder %s551_s7, %s782_s8  ;;  %p788_p13 = scmp.lt.s32.totalorder %s782_s8, %s782_s8 }
  0x92   :  { %408 = vmatpush2.msra.mxu0 %v345_v34 }
  0x93   :  { %409 = vmatprep.subr.mxu0 %v344_v35  ;;  %p789_p0 = por %p788_p13, %p787_p12 }
  0x94   :  { %410 = vmatpush2.msra.mxu0 %v343_v36 }
  0x95   :  { %411 = vmatprep.subr.mxu0 %v342_v37  ;;  %v561_v37 = vld [vmem:[%s953_s3] ss:$0 sm:$0xff]  ;;  %p790_p1 = pnand %p789_p0, %p783_p11 }
  0x96   :  { %412 = vmatpush2.msra.mxu0 %v341_v38 }
  0x97   :  { %413 = vmatprep.subr.mxu0 %v340_v39 }
  0x98   :  { %414 = vmatpush2.msra.mxu0 %v339_v40 }
  0x99   :  { %415 = vmatprep.subr.mxu0 %v338_v41 }
  0x9a   :  { %416 = vmatpush2.msra.mxu0 %v337_v42 }
  0x9b   :  { %417 = vmatprep.subr.mxu0 %v336_v43 }
  0x9c   :  { %418 = vmatpush2.msra.mxu0 %v335_v44 }
  0x9d   :  { %419 = vmatprep.subr.mxu0 %v334_v45 }
  0x9e   :  { %420 = vmatpush2.msra.mxu0 %v333_v46 }
  0x9f   :  { %421 = vmatprep.subr.mxu0 %v332_v47 }
  0xa0   :  { %422 = vmatpush2.msra.mxu0 %v331_v48 }
  0xa1   :  { %423 = vmatprep.subr.mxu0 %v330_v49 }
  0xa2   :  { %424 = vmatpush2.msra.mxu0 %v329_v50 }
 0x122   :  { %v283_v51 = vpop.f32.mrf.mxu1  ;;  %v911_v52 = vpop.f32.mrf.mxu0 }
 0x124   :  { %v630_v53 = vpop.f32.mrf.mxu1  ;;  %v214_v54 = vpop.f32.mrf.mxu0 }
 0x125   :  { %v287_v56 = vmul.f32 %v283_v51, %v214_v54 }
 0x127   :  { %v289_v57 = vmul.f32 %v288_v55, %v287_v56 }
 0x129   :  { %v290_v58 = vrot.slane %v289_v57, 4 }
 0x12b   :  { %v291_v59 = vadd.f32 %v290_v58, %v289_v57 }
 0x12d   :  { %v292_v60 = vrot.slane %v291_v59, 2 }
 0x12f   :  { %v293_v61 = vadd.f32 %v292_v60, %v291_v59 }
 0x131   :  { %v294_v62 = vrot.slane %v293_v61, 1 }
 0x133   :  { %v916_v63 = vadd.f32 %v294_v62, %v293_v61 }
 0x135   :  { %v296_v1 = vmul.f32 %v916_v63, %v916_v63 }
 0x137   :  { %425 = vmatprep.mubr.f32.mxu0 %v296_v1 }
 0x138   :  { %426 = vmatmul.mubr.f32.vlgmr.msra.gmra.mxu0 %v916_v63 }
 0x1f8   :  { %v427_v18 = vpop.f32.mrf.mxu0 }
 0x1f9   :  { %v432_v19 = vmul.f32 %v427_v18, %v427_v18  ;;  %v435_v25 = vsub.f32 %v916_v63, %v427_v18 }
 0x1fa   :  { %v429_v20 = vpop.f32.mrf.mxu0 }
 0x1fb   :  { %v433_v21 = vsub.f32 %v429_v20, %v432_v19 }
 0x1fd   :  { %v434_v22 = vmax.f32 %v433_v21, 0.0 }
 0x1ff   :  { %v436_v23 = vadd.f32 1e-05, %v434_v22 }
 0x201   :  { %680 = vrsqrt.f32 %v436_v23 }
 0x20e   :  { %v681_v27 = vpop.eup %680 }
 0x20f   :  { %v438_v29 = vmul.f32 %v681_v27, %v435_v25 }
 0x211   :  { %v440_v30 = vmul.f32 %v439_v28, %v438_v29 }
 0x213   :  { %v442_v32 = vadd.f32 %v441_v0, %v440_v30 }
 0x215   :  { %v447_v34 = vrot.slane %v442_v32, %v446_v31 }
 0x217   :  { %v448_v35 = vmul.f32 %v447_v34, %v443_v33 }
 0x219   :  { %v449_v36 = vmul.f32 %v448_v35, %v911_v52 }
 0x21b   :  { %664 = vmatmul.mubr.f32.vlgmr.msra.gmra.mxu1 %v449_v36 }
 0x2db   :  { %v539_v38 = vpop.f32.mrf.mxu1 }
 0x2dc   :  { %v540_v39 = vadd.f32 %v561_v37, %v539_v38 }
 0x2dd   :  { %v665_v40 = vpop.f32.mrf.mxu1 }
 0x2de   :  { %543 = vst [vmem:[#allocation11] sm:$0xff] %v540_v39 }
 0x2df   :  { %793 = shalt.err (!%p790_p1)
}
 0x2e0   :  { %553 = dma.vmem_to_hbm [thread:$0]  %s551_s7, 128, %s959_s9, [#allocation4]  }
 0x2e1   :  { %808 = dma.done.wait [#allocation4], 128  }
 0x2e2   :  { %809 = vsyncadd [#allocation4], 4294967168 }
 0x2e3   :  { %557 = vsyncpa [#allocation3], 1 }
 0x2e4   :  { %558 = vsyncpa [#allocation6], 1 }
 0x2e5   :  { %559 = vsyncpa [#allocation9], 1 }
 0x2e6   :  { %560 = vsyncpa [#allocation4], 1 }

// kernel: tpu_custom_call.1
= control target key start
LH: loop header
LB: loop body
LE: loop exit
PB: predicated region body
PF: predicated region fallthrough
CT: control target
= control target key end

     0   :  { %14 = vsyncpa [#allocation3], 0  ;;  %s950_s0 = inlined_call_operand.hbm [shape: f32[1,8,128], index: 0, kind: input, shape index: {}]   ;;  %s951_s1 = inlined_call_operand.hbm [shape: f32[128,384], index: 1, kind: input, shape index: {}]   ;;  %s952_s2 = inlined_call_operand.hbm [shape: f32[128,128], index: 2, kind: input, shape index: {}]   ;;  %s953_s3 = inlined_call_operand.vmem [shape: f32[1,128], index: 3, kind: input, shape index: {}]   ;;  %s954_s4 = inlined_call_operand.hbm [shape: f32[8,128], index: 4, kind: input, shape index: {}]   ;;  %s955_s5 = inlined_call_operand.vmem [shape: f32[8,128], index: 5, kind: input, shape index: {}]   ;;  %s956_s6 = inlined_call_operand.hbm [shape: f32[256,256], index: 6, kind: input, shape index: {}]   ;;  %s957_s7 = inlined_call_operand.vmem [shape: f32[1,128], index: 7, kind: input, shape index: {}]   ;;  %s958_s8 = inlined_call_operand.vmem [shape: f32[1,128], index: 8, kind: input, shape index: {}]   ;;  %s959_s9 = inlined_call_operand.hbm [shape: f32[1,8,128], index: 9, kind: output, shape index: {}]  }
   0x1   :  { %15 = vsyncpa [#allocation6], 0 }
   0x2   :  { %16 = vsyncpa [#allocation9], 0 }
   0x3   :  { %17 = vsyncpa [#allocation4], 0  ;;  %s810_s30 = smov [#allocation5]  }
   0x4   :  { %s33_s10 = sshll.u32 %s810_s30, 4  ;;  %s34_s10 = int_to_ptr.vmem [resolvable:$true] %s33_s10 }
   0x5   :  { %s690_s11 = scalar_lea.vmem %s34_s10, 6144  ;;  %p695_p1 = scmp.lt.s32.totalorder %s34_s10, %s34_s10 }
   0x6   :  { %p691_p0 = scmp.ne.s32.totalorder %s34_s10, %s690_s11  ;;  %p696_p2 = scmp.lt.s32.totalorder %s690_s11, %s690_s11 }
   0x8   :  { %p697_p3 = por %p696_p2, %p695_p1 }
   0xa   :  { %p698_p4 = pnand %p697_p3, %p691_p0 }
   0xc   :  { %701 = shalt.err (!%p698_p4)
}
   0xd   :  { %s811_s12 = smov 384   ;;  %s812_s13 = smov 24  }
   0xe   :  { %39 = dma.hbm_to_vmem [thread:$0]  %s951_s1, 6144, %s34_s10, [#allocation6], %s811_s12, %s811_s12, %s812_s13  }
   0xf   :  { %s813_s16 = smov [#allocation8]   ;;  %s814_s18 = smov [#allocation2]  }
  0x10   :  { %s60_s17 = sshll.u32 %s813_s16, 4  ;;  %s24_s19 = sshll.u32 %s814_s18, 4  ;;  %s61_s17 = int_to_ptr.vmem [resolvable:$true] %s60_s17  ;;  %s25_s19 = int_to_ptr.vmem [resolvable:$true] %s24_s19 }
  0x11   :  { %s710_s20 = scalar_lea.vmem %s61_s17, 128  ;;  %p715_p6 = scmp.lt.s32.totalorder %s61_s17, %s61_s17 }
  0x12   :  { %p711_p5 = scmp.ne.s32.totalorder %s61_s17, %s710_s20  ;;  %p716_p7 = scmp.lt.s32.totalorder %s710_s20, %s710_s20 }
  0x14   :  { %p717_p8 = por %p716_p7, %p715_p6 }
  0x16   :  { %p718_p9 = pnand %p717_p8, %p711_p5 }
  0x18   :  { %721 = shalt.err (!%p718_p9)
}
  0x19   :  { %63 = dma.hbm_to_vmem [thread:$0]  %s954_s4, 128, %s61_s17, [#allocation9]  }
  0x1a   :  { %s730_s23 = scalar_lea.vmem %s25_s19, 128  ;;  %p735_p11 = scmp.lt.s32.totalorder %s25_s19, %s25_s19 }
  0x1b   :  { %p731_p10 = scmp.ne.s32.totalorder %s25_s19, %s730_s23  ;;  %p736_p12 = scmp.lt.s32.totalorder %s730_s23, %s730_s23 }
  0x1d   :  { %p737_p13 = por %p736_p12, %p735_p11 }
  0x1f   :  { %p738_p0 = pnand %p737_p13, %p731_p10 }
  0x21   :  { %741 = shalt.err (!%p738_p0)
}
  0x22   :  { %27 = dma.hbm_to_vmem [thread:$0]  %s950_s0, 128, %s25_s19, [#allocation3]  }
  0x23   :  { %s815_s25 = smov [#allocation7]  }
  0x24   :  { %s45_s26 = sshll.u32 %s815_s25, 4  ;;  %s46_s26 = int_to_ptr.vmem [resolvable:$true] %s45_s26 }
  0x25   :  { %s750_s27 = scalar_lea.vmem %s46_s26, 2048  ;;  %p755_p2 = scmp.lt.s32.totalorder %s46_s26, %s46_s26 }
  0x26   :  { %p751_p1 = scmp.ne.s32.totalorder %s46_s26, %s750_s27  ;;  %p756_p3 = scmp.lt.s32.totalorder %s750_s27, %s750_s27 }
  0x28   :  { %p757_p4 = por %p756_p3, %p755_p2 }
  0x2a   :  { %p758_p5 = pnand %p757_p4, %p751_p1 }
  0x2c   :  { %761 = shalt.err (!%p758_p5)
}
  0x2d   :  { %s816_s4 = smov 128   ;;  %s817_s28 = smov 8  }
  0x2e   :  { %51 = dma.hbm_to_vmem [thread:$0]  %s952_s2, 2048, %s46_s26, [#allocation6], %s816_s4, %s816_s4, %s817_s28  }
  0x2f   :  { %s818_s10 = smov [#allocation10]  }
  0x30   :  { %s71_s11 = sshll.u32 %s818_s10, 4  ;;  %s72_s11 = int_to_ptr.vmem [resolvable:$true] %s71_s11 }
  0x31   :  { %s770_s0 = scalar_lea.vmem %s72_s11, 8192  ;;  %p775_p7 = scmp.lt.s32.totalorder %s72_s11, %s72_s11 }
  0x32   :  { %p771_p6 = scmp.ne.s32.totalorder %s72_s11, %s770_s0  ;;  %p776_p8 = scmp.lt.s32.totalorder %s770_s0, %s770_s0 }
  0x34   :  { %p777_p9 = por %p776_p8, %p775_p7 }
  0x36   :  { %p778_p10 = pnand %p777_p9, %p771_p6 }
  0x38   :  { %781 = shalt.err (!%p778_p10)
}
  0x39   :  { %s819_s12 = smov 256   ;;  %s820_s13 = smov 16  }
  0x3a   :  { %77 = dma.hbm_to_vmem [thread:$0]  %s956_s6, 8192, %s72_s11, [#allocation9], %s819_s12, %s819_s12, %s820_s13  }
  0x3b   :  { %802 = dma.done.wait [#allocation3], 128  }
  0x3c   :  { %803 = vsyncadd [#allocation3], 4294967168 }
  0x3d   :  { %804 = dma.done.wait [#allocation6], 8192  }
  0x3e   :  { %805 = vsyncadd [#allocation6], 4294959104 }
  0x3f   :  { %806 = dma.done.wait [#allocation9], 8320  }
  0x40   :  { %807 = vsyncadd [#allocation9], 4294958976  ;;  %v821_v0 = vmov 0.0   ;;  %vm822_vm0 = vmmov 0   ;;  %v144_v1 = vld [vmem:[#allocation5 + $0x170] sm:$0xff]  ;;  %v143_v2 = vld [vmem:[#allocation5 + $0x168] sm:$0xff] }
  0x41   :  { %596 = vmatprep.subr.mxu1 %v821_v0  ;;  %210 = vmatprep.mubr.f32.mxu0 %v821_v0  ;;  %v145_v3 = vld [vmem:[#allocation5 + $0x178] sm:$0xff]  ;;  %v140_v5 = vld [vmem:[#allocation5 + $0x150] sm:$0xff]  ;;  %v142_v6 = vld [vmem:[#allocation5 + $0x160] sm:$0xff]  ;;  %s823_s21 = smov [#allocation11]  }
  0x42   :  { %628 = vmatprep.mubr.msk.f32.mxu1 %vm822_vm0, %v821_v0  ;;  %146 = vmatprep.subr.mxu0 %v144_v1  ;;  %v141_v4 = vld [vmem:[#allocation5 + $0x158] sm:$0xff]  ;;  %v138_v7 = vld [vmem:[#allocation5 + $0x140] sm:$0xff]  ;;  %v139_v8 = vld [vmem:[#allocation5 + $0x148] sm:$0xff] }
  0x43   :  { %597 = vmatpush3.msra.mxu1 %v145_v3  ;;  %147 = vmatpush1.msra.mxu0 %v143_v2  ;;  %v137_v9 = vld [vmem:[#allocation5 + $0x138] sm:$0xff]  ;;  %v135_v10 = vld [vmem:[#allocation5 + $0x128] sm:$0xff]  ;;  %v136_v11 = vld [vmem:[#allocation5 + $0x130] sm:$0xff] }
  0x44   :  { %598 = vmatprep.subr.mxu1 %v821_v0  ;;  %148 = vmatprep.subr.mxu0 %v141_v4  ;;  %v134_v12 = vld [vmem:[#allocation5 + $0x120] sm:$0xff]  ;;  %v132_v13 = vld [vmem:[#allocation5 + $0x110] sm:$0xff]  ;;  %v133_v14 = vld [vmem:[#allocation5 + $0x118] sm:$0xff] }
  0x45   :  { %599 = vmatpush3.msra.mxu1 %v142_v6  ;;  %149 = vmatpush1.msra.mxu0 %v140_v5  ;;  %v131_v15 = vld [vmem:[#allocation5 + $0x108] sm:$0xff]  ;;  %v129_v16 = vld [vmem:[#allocation5 + $0xf8] sm:$0xff]  ;;  %v130_v17 = vld [vmem:[#allocation5 + $0x100] sm:$0xff] }
  0x46   :  { %600 = vmatprep.subr.mxu1 %v821_v0  ;;  %150 = vmatprep.subr.mxu0 %v138_v7  ;;  %v128_v18 = vld [vmem:[#allocation5 + $0xf0] sm:$0xff]  ;;  %v126_v19 = vld [vmem:[#allocation5 + $0xe0] sm:$0xff]  ;;  %v127_v20 = vld [vmem:[#allocation5 + $0xe8] sm:$0xff] }
  0x47   :  { %601 = vmatpush3.msra.mxu1 %v139_v8  ;;  %151 = vmatpush1.msra.mxu0 %v137_v9  ;;  %v125_v21 = vld [vmem:[#allocation5 + $0xd8] sm:$0xff]  ;;  %v123_v22 = vld [vmem:[#allocation5 + $0xc8] sm:$0xff]  ;;  %v124_v23 = vld [vmem:[#allocation5 + $0xd0] sm:$0xff] }
  0x48   :  { %602 = vmatprep.subr.mxu1 %v821_v0  ;;  %152 = vmatprep.subr.mxu0 %v135_v10  ;;  %v122_v24 = vld [vmem:[#allocation5 + $0xc0] sm:$0xff]  ;;  %v120_v25 = vld [vmem:[#allocation5 + $0xb0] sm:$0xff]  ;;  %v121_v26 = vld [vmem:[#allocation5 + $0xb8] sm:$0xff] }
  0x49   :  { %603 = vmatpush3.msra.mxu1 %v136_v11  ;;  %153 = vmatpush1.msra.mxu0 %v134_v12  ;;  %v119_v27 = vld [vmem:[#allocation5 + $0xa8] sm:$0xff]  ;;  %v117_v28 = vld [vmem:[#allocation5 + $0x98] sm:$0xff]  ;;  %v118_v29 = vld [vmem:[#allocation5 + $0xa0] sm:$0xff] }
  0x4a   :  { %604 = vmatprep.subr.mxu1 %v821_v0  ;;  %154 = vmatprep.subr.mxu0 %v132_v13  ;;  %v116_v30 = vld [vmem:[#allocation5 + $0x90] sm:$0xff]  ;;  %v114_v31 = vld [vmem:[#allocation5 + $0x80] sm:$0xff]  ;;  %v115_v32 = vld [vmem:[#allocation5 + $0x88] sm:$0xff] }
  0x4b   :  { %605 = vmatpush3.msra.mxu1 %v133_v14  ;;  %155 = vmatpush1.msra.mxu0 %v131_v15  ;;  %v113_v33 = vld [vmem:[#allocation5 + $0x78] sm:$0xff]  ;;  %v111_v34 = vld [vmem:[#allocation5 + $0x68] sm:$0xff]  ;;  %v112_v35 = vld [vmem:[#allocation5 + $0x70] sm:$0xff] }
  0x4c   :  { %606 = vmatprep.subr.mxu1 %v821_v0  ;;  %156 = vmatprep.subr.mxu0 %v129_v16  ;;  %v110_v36 = vld [vmem:[#allocation5 + $0x60] sm:$0xff]  ;;  %v108_v37 = vld [vmem:[#allocation5 + $0x50] sm:$0xff]  ;;  %v109_v38 = vld [vmem:[#allocation5 + $0x58] sm:$0xff] }
  0x4d   :  { %607 = vmatpush3.msra.mxu1 %v130_v17  ;;  %157 = vmatpush1.msra.mxu0 %v128_v18  ;;  %v107_v39 = vld [vmem:[#allocation5 + $0x48] sm:$0xff]  ;;  %v105_v40 = vld [vmem:[#allocation5 + $0x38] sm:$0xff]  ;;  %v106_v41 = vld [vmem:[#allocation5 + $0x40] sm:$0xff] }
  0x4e   :  { %608 = vmatprep.subr.mxu1 %v821_v0  ;;  %158 = vmatprep.subr.mxu0 %v126_v19  ;;  %v104_v42 = vld [vmem:[#allocation5 + $0x30] sm:$0xff]  ;;  %v102_v43 = vld [vmem:[#allocation5 + $0x20] sm:$0xff]  ;;  %v103_v44 = vld [vmem:[#allocation5 + $0x28] sm:$0xff] }
  0x4f   :  { %609 = vmatpush3.msra.mxu1 %v127_v20  ;;  %159 = vmatpush1.msra.mxu0 %v125_v21  ;;  %v101_v45 = vld [vmem:[#allocation5 + $0x18] sm:$0xff]  ;;  %v99_v46 = vld [vmem:[#allocation5 + $0x8] sm:$0xff]  ;;  %v100_v47 = vld [vmem:[#allocation5 + $0x10] sm:$0xff] }
  0x50   :  { %610 = vmatprep.subr.mxu1 %v821_v0  ;;  %160 = vmatprep.subr.mxu0 %v123_v22  ;;  %v98_v48 = vld [vmem:[#allocation5] sm:$0xff]  ;;  %v97_v49 = vld [vmem:[#allocation2] sm:$0xff]  ;;  %v326_v52 = vld [vmem:[#allocation10 + $0xe8] sm:$0xff] }
  0x51   :  { %611 = vmatpush3.msra.mxu1 %v124_v23  ;;  %161 = vmatpush1.msra.mxu0 %v122_v24  ;;  %v328_v50 = vld [vmem:[#allocation10 + $0xf8] sm:$0xff]  ;;  %v327_v51 = vld [vmem:[#allocation10 + $0xf0] sm:$0xff]  ;;  %v325_v53 = vld [vmem:[#allocation10 + $0xe0] sm:$0xff] }
  0x52   :  { %612 = vmatprep.subr.mxu1 %v821_v0  ;;  %162 = vmatprep.subr.mxu0 %v120_v25  ;;  %v324_v54 = vld [vmem:[#allocation10 + $0xd8] sm:$0xff]  ;;  %v323_v55 = vld [vmem:[#allocation10 + $0xd0] sm:$0xff]  ;;  %v322_v56 = vld [vmem:[#allocation10 + $0xc8] sm:$0xff] }
  0x53   :  { %613 = vmatpush3.msra.mxu1 %v121_v26  ;;  %163 = vmatpush1.msra.mxu0 %v119_v27  ;;  %v321_v57 = vld [vmem:[#allocation10 + $0xc0] sm:$0xff]  ;;  %v320_v58 = vld [vmem:[#allocation10 + $0xb8] sm:$0xff]  ;;  %v319_v59 = vld [vmem:[#allocation10 + $0xb0] sm:$0xff] }
  0x54   :  { %614 = vmatprep.subr.mxu1 %v821_v0  ;;  %164 = vmatprep.subr.mxu0 %v117_v28  ;;  %v318_v60 = vld [vmem:[#allocation10 + $0xa8] sm:$0xff]  ;;  %v317_v61 = vld [vmem:[#allocation10 + $0xa0] sm:$0xff]  ;;  %v316_v62 = vld [vmem:[#allocation10 + $0x98] sm:$0xff] }
  0x55   :  { %615 = vmatpush3.msra.mxu1 %v118_v29  ;;  %165 = vmatpush1.msra.mxu0 %v116_v30  ;;  %v315_v63 = vld [vmem:[#allocation10 + $0x90] sm:$0xff]  ;;  %v314_v1 = vld [vmem:[#allocation10 + $0x88] sm:$0xff]  ;;  %v313_v2 = vld [vmem:[#allocation10 + $0x80] sm:$0xff] }
  0x56   :  { %616 = vmatprep.subr.mxu1 %v821_v0  ;;  %166 = vmatprep.subr.mxu0 %v114_v31  ;;  %v312_v3 = vld [vmem:[#allocation10 + $0x78] sm:$0xff]  ;;  %v311_v4 = vld [vmem:[#allocation10 + $0x70] sm:$0xff]  ;;  %v310_v5 = vld [vmem:[#allocation10 + $0x68] sm:$0xff] }
  0x57   :  { %617 = vmatpush3.msra.mxu1 %v115_v32  ;;  %167 = vmatpush1.msra.mxu0 %v113_v33  ;;  %v309_v6 = vld [vmem:[#allocation10 + $0x60] sm:$0xff]  ;;  %v308_v7 = vld [vmem:[#allocation10 + $0x58] sm:$0xff]  ;;  %v307_v8 = vld [vmem:[#allocation10 + $0x50] sm:$0xff] }
  0x58   :  { %618 = vmatprep.subr.mxu1 %v821_v0  ;;  %168 = vmatprep.subr.mxu0 %v111_v34  ;;  %v306_v9 = vld [vmem:[#allocation10 + $0x48] sm:$0xff]  ;;  %v305_v10 = vld [vmem:[#allocation10 + $0x40] sm:$0xff]  ;;  %v304_v11 = vld [vmem:[#allocation10 + $0x38] sm:$0xff] }
  0x59   :  { %619 = vmatpush3.msra.mxu1 %v112_v35  ;;  %169 = vmatpush1.msra.mxu0 %v110_v36  ;;  %v303_v12 = vld [vmem:[#allocation10 + $0x30] sm:$0xff]  ;;  %v302_v13 = vld [vmem:[#allocation10 + $0x28] sm:$0xff]  ;;  %v301_v14 = vld [vmem:[#allocation10 + $0x20] sm:$0xff] }
  0x5a   :  { %620 = vmatprep.subr.mxu1 %v821_v0  ;;  %170 = vmatprep.subr.mxu0 %v108_v37  ;;  %v300_v15 = vld [vmem:[#allocation10 + $0x18] sm:$0xff]  ;;  %v299_v16 = vld [vmem:[#allocation10 + $0x10] sm:$0xff]  ;;  %v298_v17 = vld [vmem:[#allocation10 + $0x8] sm:$0xff] }
  0x5b   :  { %621 = vmatpush3.msra.mxu1 %v109_v38  ;;  %171 = vmatpush1.msra.mxu0 %v107_v39  ;;  %v297_v18 = vld [vmem:[#allocation10] sm:$0xff]  ;;  %v360_v19 = vld [vmem:[#allocation10 + $0x1f8] sm:$0xff]  ;;  %v359_v20 = vld [vmem:[#allocation10 + $0x1f0] sm:$0xff] }
  0x5c   :  { %622 = vmatprep.subr.mxu1 %v821_v0  ;;  %172 = vmatprep.subr.mxu0 %v105_v40  ;;  %v358_v21 = vld [vmem:[#allocation10 + $0x1e8] sm:$0xff]  ;;  %v357_v22 = vld [vmem:[#allocation10 + $0x1e0] sm:$0xff]  ;;  %v356_v23 = vld [vmem:[#allocation10 + $0x1d8] sm:$0xff] }
  0x5d   :  { %623 = vmatpush3.msra.mxu1 %v106_v41  ;;  %173 = vmatpush1.msra.mxu0 %v104_v42  ;;  %v355_v24 = vld [vmem:[#allocation10 + $0x1d0] sm:$0xff]  ;;  %v354_v25 = vld [vmem:[#allocation10 + $0x1c8] sm:$0xff]  ;;  %v353_v26 = vld [vmem:[#allocation10 + $0x1c0] sm:$0xff] }
  0x5e   :  { %624 = vmatprep.subr.mxu1 %v821_v0  ;;  %174 = vmatprep.subr.mxu0 %v102_v43  ;;  %v352_v27 = vld [vmem:[#allocation10 + $0x1b8] sm:$0xff]  ;;  %v351_v28 = vld [vmem:[#allocation10 + $0x1b0] sm:$0xff]  ;;  %v350_v29 = vld [vmem:[#allocation10 + $0x1a8] sm:$0xff] }
  0x5f   :  { %625 = vmatpush3.msra.mxu1 %v103_v44  ;;  %175 = vmatpush1.msra.mxu0 %v101_v45  ;;  %v349_v30 = vld [vmem:[#allocation10 + $0x1a0] sm:$0xff]  ;;  %v348_v31 = vld [vmem:[#allocation10 + $0x198] sm:$0xff]  ;;  %v347_v32 = vld [vmem:[#allocation10 + $0x190] sm:$0xff] }
  0x60   :  { %626 = vmatprep.subr.mxu1 %v821_v0  ;;  %176 = vmatprep.subr.mxu0 %v99_v46  ;;  %v346_v33 = vld [vmem:[#allocation10 + $0x188] sm:$0xff]  ;;  %v345_v34 = vld [vmem:[#allocation10 + $0x180] sm:$0xff]  ;;  %v344_v35 = vld [vmem:[#allocation10 + $0x178] sm:$0xff] }
  0x61   :  { %627 = vmatpush3.msra.mxu1 %v100_v47  ;;  %177 = vmatpush1.msra.mxu0 %v98_v48  ;;  %v343_v36 = vld [vmem:[#allocation10 + $0x170] sm:$0xff]  ;;  %v342_v37 = vld [vmem:[#allocation10 + $0x168] sm:$0xff]  ;;  %v341_v38 = vld [vmem:[#allocation10 + $0x160] sm:$0xff] }
  0x62   :  { %629 = vmatmul.mubr.f32.vlgmr.msra.gmra.mxu1 %v97_v49  ;;  %211 = vmatmul.mubr.f32.vlgmr.msra.gmra.mxu0 %v97_v49  ;;  %v340_v39 = vld [vmem:[#allocation10 + $0x158] sm:$0xff]  ;;  %v339_v40 = vld [vmem:[#allocation10 + $0x150] sm:$0xff]  ;;  %v338_v41 = vld [vmem:[#allocation10 + $0x148] sm:$0xff] }
  0x63   :  { %361 = vmatprep.subr.mxu0 %v328_v50  ;;  %631 = vmatprep.subr.mxu1 %v821_v0  ;;  %v337_v42 = vld [vmem:[#allocation10 + $0x140] sm:$0xff]  ;;  %v336_v43 = vld [vmem:[#allocation10 + $0x138] sm:$0xff]  ;;  %v335_v44 = vld [vmem:[#allocation10 + $0x130] sm:$0xff] }
  0x64   :  { %362 = vmatpush1.msra.mxu0 %v327_v51  ;;  %663 = vmatprep.mubr.msk.f32.mxu1 %vm822_vm0, %v821_v0  ;;  %v334_v45 = vld [vmem:[#allocation10 + $0x128] sm:$0xff]  ;;  %v333_v46 = vld [vmem:[#allocation10 + $0x120] sm:$0xff]  ;;  %v332_v47 = vld [vmem:[#allocation10 + $0x118] sm:$0xff] }
  0x65   :  { %363 = vmatprep.subr.mxu0 %v326_v52  ;;  %v331_v48 = vld [vmem:[#allocation10 + $0x110] sm:$0xff]  ;;  %v330_v49 = vld [vmem:[#allocation10 + $0x108] sm:$0xff]  ;;  %v329_v50 = vld [vmem:[#allocation10 + $0x100] sm:$0xff] }
  0x66   :  { %364 = vmatpush1.msra.mxu0 %v325_v53 }
  0x67   :  { %365 = vmatprep.subr.mxu0 %v324_v54 }
  0x68   :  { %366 = vmatpush1.msra.mxu0 %v323_v55  ;;  %v288_v55 = vld [vmem:[%s955_s5] sm:$0xff] }
  0x69   :  { %367 = vmatprep.subr.mxu0 %v322_v56 }
  0x6a   :  { %368 = vmatpush1.msra.mxu0 %v321_v57 }
  0x6b   :  { %369 = vmatprep.subr.mxu0 %v320_v58 }
  0x6c   :  { %370 = vmatpush1.msra.mxu0 %v319_v59 }
  0x6d   :  { %371 = vmatprep.subr.mxu0 %v318_v60 }
  0x6e   :  { %372 = vmatpush1.msra.mxu0 %v317_v61 }
  0x6f   :  { %373 = vmatprep.subr.mxu0 %v316_v62 }
  0x70   :  { %374 = vmatpush1.msra.mxu0 %v315_v63 }
  0x71   :  { %375 = vmatprep.subr.mxu0 %v314_v1 }
  0x72   :  { %376 = vmatpush1.msra.mxu0 %v313_v2  ;;  %v465_v2 = vld [vmem:[#allocation7 + $0x78] sm:$0xff] }
  0x73   :  { %377 = vmatprep.subr.mxu0 %v312_v3  ;;  %632 = vmatpush3.msra.mxu1 %v465_v2  ;;  %v464_v3 = vld [vmem:[#allocation7 + $0x70] sm:$0xff] }
  0x74   :  { %378 = vmatpush1.msra.mxu0 %v311_v4  ;;  %633 = vmatprep.subr.mxu1 %v821_v0  ;;  %v463_v4 = vld [vmem:[#allocation7 + $0x68] sm:$0xff] }
  0x75   :  { %379 = vmatprep.subr.mxu0 %v310_v5  ;;  %634 = vmatpush3.msra.mxu1 %v464_v3  ;;  %v462_v5 = vld [vmem:[#allocation7 + $0x60] sm:$0xff] }
  0x76   :  { %380 = vmatpush1.msra.mxu0 %v309_v6  ;;  %635 = vmatprep.subr.mxu1 %v821_v0  ;;  %v461_v6 = vld [vmem:[#allocation7 + $0x58] sm:$0xff] }
  0x77   :  { %381 = vmatprep.subr.mxu0 %v308_v7  ;;  %636 = vmatpush3.msra.mxu1 %v463_v4  ;;  %v460_v7 = vld [vmem:[#allocation7 + $0x50] sm:$0xff] }
  0x78   :  { %382 = vmatpush1.msra.mxu0 %v307_v8  ;;  %637 = vmatprep.subr.mxu1 %v821_v0  ;;  %v459_v8 = vld [vmem:[#allocation7 + $0x48] sm:$0xff] }
  0x79   :  { %383 = vmatprep.subr.mxu0 %v306_v9  ;;  %638 = vmatpush3.msra.mxu1 %v462_v5  ;;  %v458_v9 = vld [vmem:[#allocation7 + $0x40] sm:$0xff] }
  0x7a   :  { %384 = vmatpush1.msra.mxu0 %v305_v10  ;;  %639 = vmatprep.subr.mxu1 %v821_v0  ;;  %v457_v10 = vld [vmem:[#allocation7 + $0x38] sm:$0xff] }
  0x7b   :  { %385 = vmatprep.subr.mxu0 %v304_v11  ;;  %640 = vmatpush3.msra.mxu1 %v461_v6  ;;  %v456_v11 = vld [vmem:[#allocation7 + $0x30] sm:$0xff] }
  0x7c   :  { %386 = vmatpush1.msra.mxu0 %v303_v12  ;;  %641 = vmatprep.subr.mxu1 %v821_v0  ;;  %v455_v12 = vld [vmem:[#allocation7 + $0x28] sm:$0xff] }
  0x7d   :  { %387 = vmatprep.subr.mxu0 %v302_v13  ;;  %642 = vmatpush3.msra.mxu1 %v460_v7  ;;  %v454_v13 = vld [vmem:[#allocation7 + $0x20] sm:$0xff] }
  0x7e   :  { %388 = vmatpush1.msra.mxu0 %v301_v14  ;;  %643 = vmatprep.subr.mxu1 %v821_v0  ;;  %v453_v14 = vld [vmem:[#allocation7 + $0x18] sm:$0xff] }
  0x7f   :  { %389 = vmatprep.subr.mxu0 %v300_v15  ;;  %644 = vmatpush3.msra.mxu1 %v459_v8  ;;  %v452_v15 = vld [vmem:[#allocation7 + $0x10] sm:$0xff] }
  0x80   :  { %390 = vmatpush1.msra.mxu0 %v299_v16  ;;  %645 = vmatprep.subr.mxu1 %v821_v0  ;;  %v451_v16 = vld [vmem:[#allocation7 + $0x8] sm:$0xff] }
  0x81   :  { %391 = vmatprep.subr.mxu0 %v298_v17  ;;  %646 = vmatpush3.msra.mxu1 %v458_v9  ;;  %v450_v17 = vld [vmem:[#allocation7] sm:$0xff] }
  0x82   :  { %392 = vmatpush1.msra.mxu0 %v297_v18  ;;  %647 = vmatprep.subr.mxu1 %v821_v0 }
  0x83   :  { %393 = vmatprep.subr.mxu0 %v360_v19  ;;  %648 = vmatpush3.msra.mxu1 %v457_v10 }
  0x84   :  { %394 = vmatpush2.msra.mxu0 %v359_v20  ;;  %649 = vmatprep.subr.mxu1 %v821_v0 }
  0x85   :  { %395 = vmatprep.subr.mxu0 %v358_v21  ;;  %650 = vmatpush3.msra.mxu1 %v456_v11 }
  0x86   :  { %396 = vmatpush2.msra.mxu0 %v357_v22  ;;  %651 = vmatprep.subr.mxu1 %v821_v0 }
  0x87   :  { %397 = vmatprep.subr.mxu0 %v356_v23  ;;  %652 = vmatpush3.msra.mxu1 %v455_v12 }
  0x88   :  { %398 = vmatpush2.msra.mxu0 %v355_v24  ;;  %653 = vmatprep.subr.mxu1 %v821_v0  ;;  %v444_v24 = vlaneseq }
  0x89   :  { %399 = vmatprep.subr.mxu0 %v354_v25  ;;  %654 = vmatpush3.msra.mxu1 %v454_v13 }
  0x8a   :  { %400 = vmatpush2.msra.mxu0 %v353_v26  ;;  %655 = vmatprep.subr.mxu1 %v821_v0  ;;  %v445_v26 = vshrl.u32 %v444_v24, 7 }
  0x8b   :  { %401 = vmatprep.subr.mxu0 %v352_v27  ;;  %656 = vmatpush3.msra.mxu1 %v453_v14 }
  0x8c   :  { %402 = vmatpush2.msra.mxu0 %v351_v28  ;;  %657 = vmatprep.subr.mxu1 %v821_v0  ;;  %v439_v28 = vld [vmem:[%s957_s7] sm:$0x1]  ;;  %s550_s7 = sshll.u32 %s823_s21, 4  ;;  %s551_s7 = int_to_ptr.vmem [resolvable:$true] %s550_s7 }
  0x8d   :  { %403 = vmatprep.subr.mxu0 %v350_v29  ;;  %658 = vmatpush3.msra.mxu1 %v452_v15  ;;  %p787_p12 = scmp.lt.s32.totalorder %s551_s7, %s551_s7 }
  0x8e   :  { %404 = vmatpush2.msra.mxu0 %v349_v30  ;;  %659 = vmatprep.subr.mxu1 %v821_v0 }
  0x8f   :  { %405 = vmatprep.subr.mxu0 %v348_v31  ;;  %660 = vmatpush3.msra.mxu1 %v451_v16  ;;  %v446_v31 = vsub.s32 0, %v445_v26 }
  0x90   :  { %406 = vmatpush2.msra.mxu0 %v347_v32  ;;  %661 = vmatprep.subr.mxu1 %v821_v0  ;;  %v441_v0 = vld [vmem:[%s958_s8] sm:$0x1]  ;;  %s782_s8 = scalar_lea.vmem %s551_s7, 128 }
  0x91   :  { %407 = vmatprep.subr.mxu0 %v346_v33  ;;  %662 = vmatpush3.msra.mxu1 %v450_v17  ;;  %v443_v33 = vld [vmem:[#allocation8] sm:$0xff]  ;;  %p783_p11 = scmp.ne.s32.totalorder %s551_s7, %s782_s8  ;;  %p788_p13 = scmp.lt.s32.totalorder %s782_s8, %s782_s8 }
  0x92   :  { %408 = vmatpush2.msra.mxu0 %v345_v34 }
  0x93   :  { %409 = vmatprep.subr.mxu0 %v344_v35  ;;  %p789_p0 = por %p788_p13, %p787_p12 }
  0x94   :  { %410 = vmatpush2.msra.mxu0 %v343_v36 }
  0x95   :  { %411 = vmatprep.subr.mxu0 %v342_v37  ;;  %v561_v37 = vld [vmem:[%s953_s3] ss:$0 sm:$0xff]  ;;  %p790_p1 = pnand %p789_p0, %p783_p11 }
  0x96   :  { %412 = vmatpush2.msra.mxu0 %v341_v38 }
  0x97   :  { %413 = vmatprep.subr.mxu0 %v340_v39 }
  0x98   :  { %414 = vmatpush2.msra.mxu0 %v339_v40 }
  0x99   :  { %415 = vmatprep.subr.mxu0 %v338_v41 }
  0x9a   :  { %416 = vmatpush2.msra.mxu0 %v337_v42 }
  0x9b   :  { %417 = vmatprep.subr.mxu0 %v336_v43 }
  0x9c   :  { %418 = vmatpush2.msra.mxu0 %v335_v44 }
  0x9d   :  { %419 = vmatprep.subr.mxu0 %v334_v45 }
  0x9e   :  { %420 = vmatpush2.msra.mxu0 %v333_v46 }
  0x9f   :  { %421 = vmatprep.subr.mxu0 %v332_v47 }
  0xa0   :  { %422 = vmatpush2.msra.mxu0 %v331_v48 }
  0xa1   :  { %423 = vmatprep.subr.mxu0 %v330_v49 }
  0xa2   :  { %424 = vmatpush2.msra.mxu0 %v329_v50 }
 0x122   :  { %v283_v51 = vpop.f32.mrf.mxu1  ;;  %v911_v52 = vpop.f32.mrf.mxu0 }
 0x124   :  { %v630_v53 = vpop.f32.mrf.mxu1  ;;  %v214_v54 = vpop.f32.mrf.mxu0 }
 0x125   :  { %v287_v56 = vmul.f32 %v283_v51, %v214_v54 }
 0x127   :  { %v289_v57 = vmul.f32 %v288_v55, %v287_v56 }
 0x129   :  { %v290_v58 = vrot.slane %v289_v57, 4 }
 0x12b   :  { %v291_v59 = vadd.f32 %v290_v58, %v289_v57 }
 0x12d   :  { %v292_v60 = vrot.slane %v291_v59, 2 }
 0x12f   :  { %v293_v61 = vadd.f32 %v292_v60, %v291_v59 }
 0x131   :  { %v294_v62 = vrot.slane %v293_v61, 1 }
 0x133   :  { %v916_v63 = vadd.f32 %v294_v62, %v293_v61 }
 0x135   :  { %v296_v1 = vmul.f32 %v916_v63, %v916_v63 }
 0x137   :  { %425 = vmatprep.mubr.f32.mxu0 %v296_v1 }
 0x138   :  { %426 = vmatmul.mubr.f32.vlgmr.msra.gmra.mxu0 %v916_v63 }
 0x1f8   :  { %v427_v18 = vpop.f32.mrf.mxu0 }
 0x1f9   :  { %v432_v19 = vmul.f32 %v427_v18, %v427_v18  ;;  %v435_v25 = vsub.f32 %v916_v63, %v427_v18 }
 0x1fa   :  { %v429_v20 = vpop.f32.mrf.mxu0 }
 0x1fb   :  { %v433_v21 = vsub.f32 %v429_v20, %v432_v19 }
 0x1fd   :  { %v434_v22 = vmax.f32 %v433_v21, 0.0 }
 0x1ff   :  { %v436_v23 = vadd.f32 1e-05, %v434_v22 }
 0x201   :  { %680 = vrsqrt.f32 %v436_v23 }
 0x20e   :  { %v681_v27 = vpop.eup %680 }
 0x20f   :  { %v438_v29 = vmul.f32 %v681_v27, %v435_v25 }
 0x211   :  { %v440_v30 = vmul.f32 %v439_v28, %v438_v29 }
 0x213   :  { %v442_v32 = vadd.f32 %v441_v0, %v440_v30 }
 0x215   :  { %v447_v34 = vrot.slane %v442_v32, %v446_v31 }
 0x217   :  { %v448_v35 = vmul.f32 %v447_v34, %v443_v33 }
 0x219   :  { %v449_v36 = vmul.f32 %v448_v35, %v911_v52 }
 0x21b   :  { %664 = vmatmul.mubr.f32.vlgmr.msra.gmra.mxu1 %v449_v36 }
 0x2db   :  { %v539_v38 = vpop.f32.mrf.mxu1 }
 0x2dc   :  { %v540_v39 = vadd.f32 %v561_v37, %v539_v38 }
 0x2dd   :  { %v665_v40 = vpop.f32.mrf.mxu1 }
 0x2de   :  { %543 = vst [vmem:[#allocation11] sm:$0xff] %v540_v39 }
 0x2df   :  { %793 = shalt.err (!%p790_p1)
}
 0x2e0   :  { %553 = dma.vmem_to_hbm [thread:$0]  %s551_s7, 128, %s959_s9, [#allocation4]  }
 0x2e1   :  { %808 = dma.done.wait [#allocation4], 128  }
 0x2e2   :  { %809 = vsyncadd [#allocation4], 4294967168 }
 0x2e3   :  { %557 = vsyncpa [#allocation3], 1 }
 0x2e4   :  { %558 = vsyncpa [#allocation6], 1 }
 0x2e5   :  { %559 = vsyncpa [#allocation9], 1 }
 0x2e6   :  { %560 = vsyncpa [#allocation4], 1 }

</bundles_post_ra>
